<compile_context>
chip_gen: v7x
topology: tpu7x:2x2x1
jax: 0.10.0
libtpu: 0.0.40
codegen_flags: <defaults>
</compile_context>

<pallas_src>
import functools
from math import sqrt

import jax
import jax.numpy as jnp
from jax.experimental import pallas as pl
from jax.experimental.pallas import tpu as pltpu


def _round_up(x, m):
    return ((x + m - 1) // m) * m


# ----------------------------------------------------------------------------
# Fused kernel: whole MLP for one batch tile.
#   refs = (x_ref, w0_ref, ..., w{L-1}_ref, b_all_ref, o_ref)
# Weights / stacked biases are resident across the grid (index_map -> (0, 0)).
# ----------------------------------------------------------------------------
def _mlp_fused_kernel(*refs, activation, normalize_mlp, true_dims, pad_dims):
    x_ref = refs[0]
    o_ref = refs[-1]
    b_ref = refs[-2]
    w_refs = refs[1:-2]
    n_layers = len(w_refs)

    def pixel_norm(v, true_dim):
        # Padded columns are exactly zero, so sum(v^2) over the padded width
        # equals the sum over the true width; divide by the TRUE dim.
        ssq = jnp.sum(v * v, axis=1, keepdims=True)
        return v * jax.lax.rsqrt(ssq * (1.0 / float(true_dim)) + 1e-5)

    b_all = b_ref[...].astype(jnp.float32)          # (n_layers, max_pad_out), zero-padded

    h = x_ref[...].astype(jnp.float32)              # (tile_n, true d_in)
    if normalize_mlp:
        h = pixel_norm(h, true_dims[0])

    for l in range(n_layers):
        w = w_refs[l][...]                          # bf16 (d_in_pad, d_out_pad)
        po = pad_dims[l + 1]
        b = b_all[l:l + 1, :po]                     # (1, d_out_pad), zero-padded
        # bf16 operands, f32 accumulate on the MXU.
        y = jnp.dot(h.astype(w.dtype), w, preferred_element_type=jnp.float32)
        y = y + b
        if l != n_layers - 1:
            if activation == "relu":
                y = jnp.maximum(y, 0.0)
            elif activation == "lrelu":
                y = jnp.where(y >= 0.0, y, 0.2 * y)
            else:
                raise NotImplementedError(f"activation={activation!r}")
        if normalize_mlp:
            y = pixel_norm(y, true_dims[l + 1])
        h = y

    o_ref[...] = h.astype(o_ref.dtype)


# ----------------------------------------------------------------------------
# One-time parameter packing: pad/align weights & stack biases (cache & reuse).
# ----------------------------------------------------------------------------
def pack_mlp_params(params):
    """params: list of (W[in,out] f32, b[out] f32).  Returns padded operands."""
    n_layers = len(params)
    true_dims = (params[0][0].shape[0],) + tuple(w.shape[1] for w, _ in params)
    pad_out = tuple(_round_up(d, 128) for d in true_dims[1:])   # lane-dense features

    w_padded = []
    for l, (w, _) in enumerate(params):
        # First layer keeps the TRUE input dim (matches the unpadded x); later
        # layers pad the in-dim to the previous layer's padded out-width.
        pi = true_dims[0] if l == 0 else pad_out[l - 1]
        po = pad_out[l]
        wp = jnp.zeros((pi, po), jnp.bfloat16)
        wp = wp.at[:true_dims[l], :true_dims[l + 1]].set(w.astype(jnp.bfloat16))
        w_padded.append(wp)

    max_po = max(pad_out)
    b_all = jnp.zeros((n_layers, max_po), jnp.float32)
    for l, (_, b) in enumerate(params):
        b_all = b_all.at[l, :true_dims[l + 1]].set(b.astype(jnp.float32))

    return dict(weights=tuple(w_padded), biases=b_all,
                true_dims=true_dims, pad_out=pad_out)


# ----------------------------------------------------------------------------
# Wrapper: gridded fused pallas_call (no wrapper-side padding copies).
# ----------------------------------------------------------------------------
def mlp_forward(x, packed, activation="relu", normalize_mlp=False, tile_n=512,
                out_dtype=jnp.bfloat16, use_core_parallel=False):
    if activation not in ("relu", "lrelu"):
        # TODO(synk): 'blrelu' (BidirectionalLeakyReLU) not defined in the source.
        raise NotImplementedError(f"activation={activation!r} is not supported")

    weights = packed["weights"]
    b_all = packed["biases"]
    true_dims = packed["true_dims"]
    pad_out = packed["pad_out"]
    n, d_in = x.shape
    assert d_in == true_dims[0], "input feature dim mismatch"
    n_layers = len(weights)
    pad_dims = (d_in,) + pad_out

    # Batch tile: 16-row aligned (bf16 sublane packing), as large as the batch
    # allows; partial last tile handled by masked output stores (no N padding).
    tile_n = max(16, _round_up(min(tile_n, n), 16))
    num_tiles = pl.cdiv(n, tile_n)

    flat_inputs = [x]
    in_specs = [pl.BlockSpec((tile_n, d_in), lambda i: (i, 0))]       # streamed
    for wp in weights:
        pi, po = wp.shape
        flat_inputs.append(wp)
        in_specs.append(pl.BlockSpec((pi, po), lambda i: (0, 0)))     # resident
    flat_inputs.append(b_all)
    in_specs.append(pl.BlockSpec(b_all.shape, lambda i: (0, 0)))      # resident

    out_itemsize = jnp.dtype(out_dtype).itemsize
    x_bytes = x.size * x.dtype.itemsize
    w_bytes = sum(w.size * 2 for w in weights) + b_all.size * 4
    out_bytes = n * pad_dims[-1] * out_itemsize
    flops = sum(2 * n * w.shape[0] * w.shape[1] for w in weights)

    # VMEM footprint: double-buffered streamed x/out tiles + (double-buffered)
    # resident weights + a few f32 intermediates; clamp to v7x-safe 64 MiB.
    vmem_est = (2 * tile_n * d_in * x.dtype.itemsize
                + 2 * tile_n * pad_dims[-1] * out_itemsize
                + 2 * w_bytes
                + 3 * tile_n * max(pad_dims) * 4)
    vmem_limit = int(min(max(vmem_est * 5 // 4, 16 * 2 ** 20), 64 * 2 ** 20))

    # On v7x pass use_core_parallel=True to shard batch tiles across both TCs.
    batch_sem = pltpu.CORE_PARALLEL if use_core_parallel else pltpu.PARALLEL

    kernel = functools.partial(
        _mlp_fused_kernel,
        activation=activation,
        normalize_mlp=normalize_mlp,
        true_dims=true_dims,
        pad_dims=pad_dims,
    )

    out_pad = pl.pallas_call(
        kernel,
        out_shape=jax.ShapeDtypeStruct((n, pad_dims[-1]), out_dtype),
        grid=(num_tiles,),
        in_specs=in_specs,
        out_specs=pl.BlockSpec((tile_n, pad_dims[-1]), lambda i: (i, 0)),
        compiler_params=pltpu.CompilerParams(
            dimension_semantics=(batch_sem,),
            vmem_limit_bytes=vmem_limit),
        cost_estimate=pl.CostEstimate(
            flops=flops,
            transcendentals=(n * (n_layers + 1)) if normalize_mlp else 0,
            bytes_accessed=x_bytes + w_bytes + out_bytes),
    )(*flat_inputs)

    return out_pad[:, :true_dims[-1]]


# ----------------------------------------------------------------------------
# Parameter construction (deterministic, mirrors PyTorch init semantics)
# ----------------------------------------------------------------------------
def init_mlp_params(key, input_dim, out_dim, fc_dim, n_fc, weight_norm=False):
    """Returns list of (W[in,out], b[out]) with EqualLR scaling already folded in."""
    dims = [input_dim] + [fc_dim] * (n_fc - 1) + [out_dim]
    params = []
    for i in range(n_fc):
        d_in, d_out = dims[i], dims[i + 1]
        key, kw, kb = jax.random.split(key, 3)
        if weight_norm:
            # EqualLinear: weight ~ N(0,1), bias = 0, runtime scale sqrt(2/fan_in)
            w = jax.random.normal(kw, (d_out, d_in), jnp.float32) * sqrt(2.0 / d_in)
            b = jnp.zeros((d_out,), jnp.float32)
        else:
            # nn.Linear default: U(-1/sqrt(fan_in), 1/sqrt(fan_in)) for W and b
            bound = 1.0 / sqrt(d_in)
            w = jax.random.uniform(kw, (d_out, d_in), jnp.float32, -bound, bound)
            b = jax.random.uniform(kb, (d_out,), jnp.float32, -bound, bound)
        params.append((w.T, b))   # store (in, out) for x @ W
    return params


# ----------------------------------------------------------------------------
# Pure-JAX reference with the SAME bf16-operand / f32-accumulate math.
# ----------------------------------------------------------------------------
def mlp_reference(x, params, activation="relu", normalize_mlp=False,
                  out_dtype=jnp.bfloat16):
    def pnorm(v):
        return v / jnp.sqrt(jnp.mean(v * v, axis=1, keepdims=True) + 1e-5)

    h = x.astype(jnp.float32)
    if normalize_mlp:
        h = pnorm(h)
    n_layers = len(params)
    for i, (w, b) in enumerate(params):
        h = jnp.dot(h.astype(jnp.bfloat16), w.astype(jnp.bfloat16),
                    preferred_element_type=jnp.float32) + b.reshape(1, -1)
        if i != n_layers - 1:
            if activation == "relu":
                h = jnp.maximum(h, 0.0)
            elif activation == "lrelu":
                h = jnp.where(h >= 0.0, h, 0.2 * h)
        if normalize_mlp:
            h = pnorm(h)
    return h.astype(out_dtype)


if __name__ == "__main__":
    # Small shapes consistent with MLP(input_dim, out_dim, fc_dim, n_fc).
    batch, input_dim, out_dim, fc_dim, n_fc = 512, 16, 8, 32, 4

    key = jax.random.PRNGKey(0)
    key, kx = jax.random.split(key)
    x = jax.random.normal(kx, (batch, input_dim), jnp.float32)

    # Default config: weight_norm=False, activation='relu', normalize_mlp=False.
    params = init_mlp_params(key, input_dim, out_dim, fc_dim, n_fc, weight_norm=False)
    packed = pack_mlp_params(params)          # padded ONCE, reused across calls
    out = jax.block_until_ready(
        mlp_forward(x, packed, activation="relu", normalize_mlp=False, tile_n=512))
    ref = mlp_reference(x, params, activation="relu", normalize_mlp=False)
    assert out.shape == (batch, out_dim)
    assert out.dtype == jnp.bfloat16
    assert jnp.allclose(out.astype(jnp.float32), ref.astype(jnp.float32),
                        atol=1e-2, rtol=1e-2), "mismatch vs reference (relu)"

    # EqualLR + LeakyReLU(0.2) + PixelNorm variant through the same fused kernel.
    params_eq = init_mlp_params(key, input_dim, out_dim, fc_dim, n_fc, weight_norm=True)
    packed_eq = pack_mlp_params(params_eq)
    out2 = jax.block_until_ready(
        mlp_forward(x, packed_eq, activation="lrelu", normalize_mlp=True, tile_n=512))
    ref2 = mlp_reference(x, params_eq, activation="lrelu", normalize_mlp=True)
    assert out2.shape == (batch, out_dim)
    assert jnp.allclose(out2.astype(jnp.float32), ref2.astype(jnp.float32),
                        atol=1e-2, rtol=1e-2), "mismatch vs reference (lrelu+pixelnorm)"

    print("KERNEL_OK")
</pallas_src>

<mosaic_0001>
module attributes {stable_mosaic.version = 11 : i64} {
  func.func @_mlp_fused_kernel(%arg0: i32, %arg1: memref<512x16xf32, #tpu.memory_space<vmem>>, %arg2: memref<16x128xbf16, #tpu.memory_space<vmem>>, %arg3: memref<128x128xbf16, #tpu.memory_space<vmem>>, %arg4: memref<128x128xbf16, #tpu.memory_space<vmem>>, %arg5: memref<128x128xbf16, #tpu.memory_space<vmem>>, %arg6: memref<4x128xf32, #tpu.memory_space<vmem>>, %arg7: memref<512x128xbf16, #tpu.memory_space<vmem>>) attributes {dimension_semantics = [#tpu.dimension_semantics<parallel>], iteration_bounds = array<i64: 1>, scalar_prefetch = 0 : i64, scratch_operands = 0 : i64, tpu.core_type = #tpu.core_type<tc>, window_params = [{transform_indices = @transform_0, window_bounds = array<i64: 512, 16>}, {pipeline_mode = #tpu.pipeline_mode<synchronous>, transform_indices = @transform_1, window_bounds = array<i64: 16, 128>}, {pipeline_mode = #tpu.pipeline_mode<synchronous>, transform_indices = @transform_2, window_bounds = array<i64: 128, 128>}, {pipeline_mode = #tpu.pipeline_mode<synchronous>, transform_indices = @transform_3, window_bounds = array<i64: 128, 128>}, {pipeline_mode = #tpu.pipeline_mode<synchronous>, transform_indices = @transform_4, window_bounds = array<i64: 128, 128>}, {pipeline_mode = #tpu.pipeline_mode<synchronous>, transform_indices = @transform_5, window_bounds = array<i64: 4, 128>}, {transform_indices = @transform_6, window_bounds = array<i64: 512, 128>}]} {
    %c0 = arith.constant 0 : index
    %c0_0 = arith.constant 0 : index
    %0 = vector.load %arg6[%c0, %c0_0] : memref<4x128xf32, #tpu.memory_space<vmem>>, vector<4x128xf32>
    %c0_1 = arith.constant 0 : index
    %c0_2 = arith.constant 0 : index
    %1 = vector.load %arg1[%c0_1, %c0_2] : memref<512x16xf32, #tpu.memory_space<vmem>>, vector<512x16xf32>
    %c0_3 = arith.constant 0 : index
    %c0_4 = arith.constant 0 : index
    %2 = vector.load %arg2[%c0_3, %c0_4] : memref<16x128xbf16, #tpu.memory_space<vmem>>, vector<16x128xbf16>
    %3 = vector.extract_strided_slice %0 {offsets = [0, 0], sizes = [1, 128], strides = [1, 1]} : vector<4x128xf32> to vector<1x128xf32>
    %4 = arith.truncf %1 : vector<512x16xf32> to vector<512x16xbf16>
    %cst = arith.constant dense<0.000000e+00> : vector<512x128xf32>
    %5 = tpu.matmul %4, %2, %cst {dimension_numbers = #tpu.dot_dimension_numbers<[1], [0], [0], [1], [0, 0, 1, 1], [], []>} : vector<512x16xbf16>, vector<16x128xbf16>, vector<512x128xf32> -> vector<512x128xf32>
    %6 = vector.broadcast %3 : vector<1x128xf32> to vector<512x128xf32>
    %7 = arith.addf %5, %6 : vector<512x128xf32>
    %cst_5 = arith.constant 0.000000e+00 : f32
    %8 = vector.broadcast %cst_5 : f32 to vector<512x128xf32>
    %9 = arith.maximumf %7, %8 : vector<512x128xf32>
    %c0_6 = arith.constant 0 : index
    %c0_7 = arith.constant 0 : index
    %10 = vector.load %arg3[%c0_6, %c0_7] : memref<128x128xbf16, #tpu.memory_space<vmem>>, vector<128x128xbf16>
    %11 = vector.extract_strided_slice %0 {offsets = [1, 0], sizes = [1, 128], strides = [1, 1]} : vector<4x128xf32> to vector<1x128xf32>
    %12 = arith.truncf %9 : vector<512x128xf32> to vector<512x128xbf16>
    %cst_8 = arith.constant dense<0.000000e+00> : vector<512x128xf32>
    %13 = tpu.matmul %12, %10, %cst_8 {dimension_numbers = #tpu.dot_dimension_numbers<[1], [0], [0], [1], [0, 0, 1, 1], [], []>} : vector<512x128xbf16>, vector<128x128xbf16>, vector<512x128xf32> -> vector<512x128xf32>
    %14 = vector.broadcast %11 : vector<1x128xf32> to vector<512x128xf32>
    %15 = arith.addf %13, %14 : vector<512x128xf32>
    %cst_9 = arith.constant 0.000000e+00 : f32
    %16 = vector.broadcast %cst_9 : f32 to vector<512x128xf32>
    %17 = arith.maximumf %15, %16 : vector<512x128xf32>
    %c0_10 = arith.constant 0 : index
    %c0_11 = arith.constant 0 : index
    %18 = vector.load %arg4[%c0_10, %c0_11] : memref<128x128xbf16, #tpu.memory_space<vmem>>, vector<128x128xbf16>
    %19 = vector.extract_strided_slice %0 {offsets = [2, 0], sizes = [1, 128], strides = [1, 1]} : vector<4x128xf32> to vector<1x128xf32>
    %20 = arith.truncf %17 : vector<512x128xf32> to vector<512x128xbf16>
    %cst_12 = arith.constant dense<0.000000e+00> : vector<512x128xf32>
    %21 = tpu.matmul %20, %18, %cst_12 {dimension_numbers = #tpu.dot_dimension_numbers<[1], [0], [0], [1], [0, 0, 1, 1], [], []>} : vector<512x128xbf16>, vector<128x128xbf16>, vector<512x128xf32> -> vector<512x128xf32>
    %22 = vector.broadcast %19 : vector<1x128xf32> to vector<512x128xf32>
    %23 = arith.addf %21, %22 : vector<512x128xf32>
    %cst_13 = arith.constant 0.000000e+00 : f32
    %24 = vector.broadcast %cst_13 : f32 to vector<512x128xf32>
    %25 = arith.maximumf %23, %24 : vector<512x128xf32>
    %c0_14 = arith.constant 0 : index
    %c0_15 = arith.constant 0 : index
    %26 = vector.load %arg5[%c0_14, %c0_15] : memref<128x128xbf16, #tpu.memory_space<vmem>>, vector<128x128xbf16>
    %27 = vector.extract_strided_slice %0 {offsets = [3, 0], sizes = [1, 128], strides = [1, 1]} : vector<4x128xf32> to vector<1x128xf32>
    %28 = arith.truncf %25 : vector<512x128xf32> to vector<512x128xbf16>
    %cst_16 = arith.constant dense<0.000000e+00> : vector<512x128xf32>
    %29 = tpu.matmul %28, %26, %cst_16 {dimension_numbers = #tpu.dot_dimension_numbers<[1], [0], [0], [1], [0, 0, 1, 1], [], []>} : vector<512x128xbf16>, vector<128x128xbf16>, vector<512x128xf32> -> vector<512x128xf32>
    %30 = vector.broadcast %27 : vector<1x128xf32> to vector<512x128xf32>
    %31 = arith.addf %29, %30 : vector<512x128xf32>
    %32 = arith.truncf %31 : vector<512x128xf32> to vector<512x128xbf16>
    %c0_17 = arith.constant 0 : index
    %c0_18 = arith.constant 0 : index
    %33 = vector.load %arg7[%c0_17, %c0_18] : memref<512x128xbf16, #tpu.memory_space<vmem>>, vector<512x128xbf16>
    tpu.vector_store %arg7[%c0_17, %c0_18], %32 {strides = array<i32>} : memref<512x128xbf16, #tpu.memory_space<vmem>>, vector<512x128xbf16>,
    return
  }
  func.func @transform_0(%arg0: i32) -> (i32, i32) {
    %c0_i32 = arith.constant 0 : i32
    %c0_i32_0 = arith.constant 0 : i32
    return %arg0, %c0_i32 : i32, i32
  }
  func.func @transform_1(%arg0: i32) -> (i32, i32) {
    %c0_i32 = arith.constant 0 : i32
    %c0_i32_0 = arith.constant 0 : i32
    %c0_i32_1 = arith.constant 0 : i32
    return %c0_i32, %c0_i32_0 : i32, i32
  }
  func.func @transform_2(%arg0: i32) -> (i32, i32) {
    %c0_i32 = arith.constant 0 : i32
    %c0_i32_0 = arith.constant 0 : i32
    %c0_i32_1 = arith.constant 0 : i32
    return %c0_i32, %c0_i32_0 : i32, i32
  }
  func.func @transform_3(%arg0: i32) -> (i32, i32) {
    %c0_i32 = arith.constant 0 : i32
    %c0_i32_0 = arith.constant 0 : i32
    %c0_i32_1 = arith.constant 0 : i32
    return %c0_i32, %c0_i32_0 : i32, i32
  }
  func.func @transform_4(%arg0: i32) -> (i32, i32) {
    %c0_i32 = arith.constant 0 : i32
    %c0_i32_0 = arith.constant 0 : i32
    %c0_i32_1 = arith.constant 0 : i32
    return %c0_i32, %c0_i32_0 : i32, i32
  }
  func.func @transform_5(%arg0: i32) -> (i32, i32) {
    %c0_i32 = arith.constant 0 : i32
    %c0_i32_0 = arith.constant 0 : i32
    %c0_i32_1 = arith.constant 0 : i32
    return %c0_i32, %c0_i32_0 : i32, i32
  }
  func.func @transform_6(%arg0: i32) -> (i32, i32) {
    %c0_i32 = arith.constant 0 : i32
    %c0_i32_0 = arith.constant 0 : i32
    return %arg0, %c0_i32 : i32, i32
  }
}

</mosaic_0001>

<bundles_post_ra>
// kernel: tpu_custom_call.1
= control target key start
LH: loop header
LB: loop body
LE: loop exit
PB: predicated region body
PF: predicated region fallthrough
CT: control target
= control target key end

     0   :  { %vm134_vm0 = vcmask 130048   ;;  %s3752_s0 = inlined_call_operand.vmem [shape: f32[512,16], index: 0, kind: input, shape index: {}]   ;;  %s3753_s1 = inlined_call_operand.vmem [shape: bf16[16,128], index: 1, kind: input, shape index: {}]   ;;  %s3754_s2 = inlined_call_operand.vmem [shape: bf16[128,128], index: 2, kind: input, shape index: {}]   ;;  %s3755_s3 = inlined_call_operand.vmem [shape: bf16[128,128], index: 3, kind: input, shape index: {}]   ;;  %s3756_s4 = inlined_call_operand.vmem [shape: bf16[128,128], index: 4, kind: input, shape index: {}]   ;;  %s3757_s5 = inlined_call_operand.vmem [shape: f32[4,128], index: 5, kind: input, shape index: {}]   ;;  %s3758_s6 = inlined_call_operand.hbm [shape: bf16[512,128], index: 6, kind: output, shape index: {}]  }
   0x1   :  { %v3069_v0 = vld [vmem:[%s3753_s1] sm:$0xff]   ;;  %v27_v2 = vld [vmem:[%s3752_s0 + $0x8] sm:$0xff]  ;;  %v28_v3 = vld [vmem:[%s3752_s0 + $0x10] sm:$0xff] }
   0x2   :  { %v26_v1 = vld [vmem:[%s3752_s0] sm:$0xff]  ;;  %2744 = vmatprep.subr.bf16.mxu0 %v3069_v0  ;;  %v29_v5 = vld [vmem:[%s3752_s0 + $0x18] sm:$0xff]  ;;  %v31_v7 = vld [vmem:[%s3752_s0 + $0x28] sm:$0xff] }
   0x3   :  { %v92_v4 = vpack.c.bf16 %v27_v2, %v26_v1  ;;  %v30_v6 = vld [vmem:[%s3752_s0 + $0x20] sm:$0xff]  ;;  %2745 = vmatpush3.bf16.msra.mxu0 %v3069_v0  ;;  %v93_v8 = vpack.c.bf16 %v29_v5, %v28_v3  ;;  %v32_v10 = vld [vmem:[%s3752_s0 + $0x30] sm:$0xff]  ;;  %v33_v11 = vld [vmem:[%s3752_s0 + $0x38] sm:$0xff] }
   0x4   :  { %v94_v9 = vpack.c.bf16 %v31_v7, %v30_v6  ;;  %v34_v12 = vld [vmem:[%s3752_s0 + $0x40] sm:$0xff]  ;;  %v35_v13 = vld [vmem:[%s3752_s0 + $0x48] sm:$0xff]  ;;  %v95_v14 = vpack.c.bf16 %v33_v11, %v32_v10  ;;  %v36_v16 = vld [vmem:[%s3752_s0 + $0x50] sm:$0xff] }
   0x5   :  { %2746 = vmatprep.mubr.msk.bf16.mxu0 %vm134_vm0, %v92_v4  ;;  %v96_v15 = vpack.c.bf16 %v35_v13, %v34_v12  ;;  %v37_v17 = vld [vmem:[%s3752_s0 + $0x58] sm:$0xff]  ;;  %v38_v18 = vld [vmem:[%s3752_s0 + $0x60] sm:$0xff]  ;;  %v39_v19 = vld [vmem:[%s3752_s0 + $0x68] sm:$0xff] }
   0x6   :  { %2747 = vmatmul.mubr.msk.bf16.vlgmr.msra.gmra.mrb[0].mxu0 %vm134_vm0, %v93_v8  ;;  %v97_v20 = vpack.c.bf16 %v37_v17, %v36_v16  ;;  %v98_v21 = vpack.c.bf16 %v39_v19, %v38_v18  ;;  %v40_v22 = vld [vmem:[%s3752_s0 + $0x70] sm:$0xff]  ;;  %v41_v23 = vld [vmem:[%s3752_s0 + $0x78] sm:$0xff]  ;;  %v42_v24 = vld [vmem:[%s3752_s0 + $0x80] sm:$0xff] }
   0x7   :  { %2750 = vmatprep.mubr.msk.bf16.mxu0 %vm134_vm0, %v94_v9  ;;  %v43_v25 = vld [vmem:[%s3752_s0 + $0x88] sm:$0xff]  ;;  %v3070_v26 = vld [vmem:[%s3754_s2] sm:$0xff]   ;;  %v99_v28 = vpack.c.bf16 %v41_v23, %v40_v22  ;;  %v3072_v30 = vld [vmem:[%s3754_s2 + $0x10] sm:$0xff]  }
   0x8   :  { %v3071_v27 = vld [vmem:[%s3754_s2 + $0x8] sm:$0xff]   ;;  %2810 = vmatprep.subr.bf16.mxu1 %v3070_v26  ;;  %v100_v29 = vpack.c.bf16 %v43_v25, %v42_v24  ;;  %v44_v31 = vld [vmem:[%s3752_s0 + $0x90] sm:$0xff]  ;;  %v45_v32 = vld [vmem:[%s3752_s0 + $0x98] sm:$0xff] }
   0x9   :  { %2811 = vmatpush3.bf16.msra.mxu1 %v3070_v26  ;;  %v3073_v33 = vld [vmem:[%s3754_s2 + $0x18] sm:$0xff]   ;;  %v46_v34 = vld [vmem:[%s3752_s0 + $0xa0] sm:$0xff]  ;;  %v47_v35 = vld [vmem:[%s3752_s0 + $0xa8] sm:$0xff]  ;;  %v101_v37 = vpack.c.bf16 %v45_v32, %v44_v31 }
   0xa   :  { %2812 = vmatprep.subr.bf16.mxu1 %v3071_v27  ;;  %v3074_v36 = vld [vmem:[%s3754_s2 + $0x20] sm:$0xff]   ;;  %v102_v38 = vpack.c.bf16 %v47_v35, %v46_v34  ;;  %v48_v39 = vld [vmem:[%s3752_s0 + $0xb0] sm:$0xff]  ;;  %v49_v40 = vld [vmem:[%s3752_s0 + $0xb8] sm:$0xff] }
   0xb   :  { %v3075_v41 = vld [vmem:[%s3754_s2 + $0x28] sm:$0xff]   ;;  %v50_v42 = vld [vmem:[%s3752_s0 + $0xc0] sm:$0xff] }
   0xc   :  { %v51_v43 = vld [vmem:[%s3752_s0 + $0xc8] sm:$0xff] }
   0xd   :  { %2813 = vmatpush3.bf16.msra.mxu1 %v3071_v27 }
   0xe   :  { %2751 = vmatmul.mubr.msk.bf16.gmra.mrb[4].mxu0 %vm134_vm0, %v95_v14  ;;  %2814 = vmatprep.subr.bf16.mxu1 %v3072_v30 }
   0xf   :  { %2754 = vmatprep.mubr.msk.bf16.mxu0 %vm134_vm0, %v96_v15 }
  0x11   :  { %2815 = vmatpush3.bf16.msra.mxu1 %v3072_v30 }
  0x12   :  { %2816 = vmatprep.subr.bf16.mxu1 %v3073_v33 }
  0x15   :  { %2817 = vmatpush3.bf16.msra.mxu1 %v3073_v33 }
  0x16   :  { %2755 = vmatmul.mubr.msk.bf16.gmra.mrb[8].mxu0 %vm134_vm0, %v97_v20  ;;  %2818 = vmatprep.subr.bf16.mxu1 %v3074_v36 }
  0x17   :  { %2758 = vmatprep.mubr.msk.bf16.mxu0 %vm134_vm0, %v98_v21 }
  0x1e   :  { %2759 = vmatmul.mubr.msk.bf16.gmra.mrb[12].mxu0 %vm134_vm0, %v99_v28 }
  0x1f   :  { %2762 = vmatprep.mubr.msk.bf16.mxu0 %vm134_vm0, %v100_v29 }
  0x26   :  { %2763 = vmatmul.mubr.msk.bf16.gmra.mrb[16].mxu0 %vm134_vm0, %v101_v37 }
  0x27   :  { %2766 = vmatprep.mubr.msk.bf16.mxu0 %vm134_vm0, %v102_v38 }
  0x28   :  { %11 = vsyncpa [#allocation3], 0  ;;  %v103_v44 = vpack.c.bf16 %v49_v40, %v48_v39  ;;  %2819 = vmatpush3.bf16.msra.mxu1 %v3074_v36  ;;  %v104_v45 = vpack.c.bf16 %v51_v43, %v50_v42  ;;  %v52_v46 = vld [vmem:[%s3752_s0 + $0xd0] sm:$0xff]  ;;  %v53_v47 = vld [vmem:[%s3752_s0 + $0xd8] sm:$0xff]  ;;  %v124_v42 = vlaneseq }
  0x29   :  { %2820 = vmatprep.subr.bf16.mxu1 %v3075_v41  ;;  %v54_v48 = vld [vmem:[%s3752_s0 + $0xe0] sm:$0xff]  ;;  %v55_v49 = vld [vmem:[%s3752_s0 + $0xe8] sm:$0xff]  ;;  %v105_v50 = vpack.c.bf16 %v53_v47, %v52_v46  ;;  %v56_v52 = vld [vmem:[%s3752_s0 + $0xf0] sm:$0xff] }
  0x2a   :  { %v106_v51 = vpack.c.bf16 %v55_v49, %v54_v48  ;;  %v57_v53 = vld [vmem:[%s3752_s0 + $0xf8] sm:$0xff]  ;;  %v58_v54 = vld [vmem:[%s3752_s0 + $0x100] sm:$0xff]  ;;  %v59_v55 = vld [vmem:[%s3752_s0 + $0x108] sm:$0xff]  ;;  %v3411_v43 = vshrl.u32 %v124_v42, 7 }
  0x2b   :  { %v107_v56 = vpack.c.bf16 %v57_v53, %v56_v52  ;;  %v108_v57 = vpack.c.bf16 %v59_v55, %v58_v54  ;;  %v60_v58 = vld [vmem:[%s3752_s0 + $0x110] sm:$0xff]  ;;  %v61_v59 = vld [vmem:[%s3752_s0 + $0x118] sm:$0xff]  ;;  %v62_v60 = vld [vmem:[%s3752_s0 + $0x120] sm:$0xff] }
  0x2c   :  { %2821 = vmatpush3.bf16.msra.mxu1 %v3075_v41  ;;  %v63_v61 = vld [vmem:[%s3752_s0 + $0x128] sm:$0xff]  ;;  %v109_v62 = vpack.c.bf16 %v61_v59, %v60_v58  ;;  %v64_v0 = vld [vmem:[%s3752_s0 + $0x130] sm:$0xff]  ;;  %v65_v1 = vld [vmem:[%s3752_s0 + $0x138] sm:$0xff] }
  0x2d   :  { %v110_v63 = vpack.c.bf16 %v63_v61, %v62_v60  ;;  %v66_v2 = vld [vmem:[%s3752_s0 + $0x140] sm:$0xff]  ;;  %v67_v3 = vld [vmem:[%s3752_s0 + $0x148] sm:$0xff]  ;;  %v111_v4 = vpack.c.bf16 %v65_v1, %v64_v0  ;;  %v68_v6 = vld [vmem:[%s3752_s0 + $0x150] sm:$0xff] }
  0x2e   :  { %2767 = vmatmul.mubr.msk.bf16.gmra.mrb[20].mxu0 %vm134_vm0, %v103_v44  ;;  %v112_v5 = vpack.c.bf16 %v67_v3, %v66_v2  ;;  %v69_v7 = vld [vmem:[%s3752_s0 + $0x158] sm:$0xff]  ;;  %v70_v8 = vld [vmem:[%s3752_s0 + $0x160] sm:$0xff]  ;;  %v71_v9 = vld [vmem:[%s3752_s0 + $0x168] sm:$0xff]  ;;  %v126_v44 = vsub.s32 0, %v3411_v43 }
  0x2f   :  { %2770 = vmatprep.mubr.msk.bf16.mxu0 %vm134_vm0, %v104_v45  ;;  %v113_v10 = vpack.c.bf16 %v69_v7, %v68_v6  ;;  %v114_v11 = vpack.c.bf16 %v71_v9, %v70_v8  ;;  %v72_v12 = vld [vmem:[%s3752_s0 + $0x170] sm:$0xff]  ;;  %v73_v13 = vld [vmem:[%s3752_s0 + $0x178] sm:$0xff]  ;;  %v74_v14 = vld [vmem:[%s3752_s0 + $0x180] sm:$0xff] }
  0x30   :  { %v75_v15 = vld [vmem:[%s3752_s0 + $0x188] sm:$0xff]  ;;  %v115_v16 = vpack.c.bf16 %v73_v13, %v72_v12  ;;  %v3076_v17 = vld [vmem:[%s3754_s2 + $0x30] sm:$0xff]   ;;  %v3077_v19 = vld [vmem:[%s3754_s2 + $0x38] sm:$0xff]  }
  0x31   :  { %v116_v18 = vpack.c.bf16 %v75_v15, %v74_v14  ;;  %2822 = vmatprep.subr.bf16.mxu1 %v3076_v17  ;;  %v76_v20 = vld [vmem:[%s3752_s0 + $0x190] sm:$0xff]  ;;  %v77_v21 = vld [vmem:[%s3752_s0 + $0x198] sm:$0xff]  ;;  %v78_v22 = vld [vmem:[%s3752_s0 + $0x1a0] sm:$0xff] }
  0x32   :  { %2823 = vmatpush3.bf16.msra.mxu1 %v3076_v17  ;;  %v79_v23 = vld [vmem:[%s3752_s0 + $0x1a8] sm:$0xff]  ;;  %v117_v24 = vpack.c.bf16 %v77_v21, %v76_v20  ;;  %v80_v26 = vld [vmem:[%s3752_s0 + $0x1b0] sm:$0xff]  ;;  %v81_v27 = vld [vmem:[%s3752_s0 + $0x1b8] sm:$0xff] }
  0x33   :  { %2824 = vmatprep.subr.bf16.mxu1 %v3077_v19  ;;  %v118_v25 = vpack.c.bf16 %v79_v23, %v78_v22  ;;  %v82_v28 = vld [vmem:[%s3752_s0 + $0x1c0] sm:$0xff]  ;;  %v83_v29 = vld [vmem:[%s3752_s0 + $0x1c8] sm:$0xff]  ;;  %v119_v30 = vpack.c.bf16 %v81_v27, %v80_v26  ;;  %v84_v32 = vld [vmem:[%s3752_s0 + $0x1d0] sm:$0xff] }
  0x34   :  { %v120_v31 = vpack.c.bf16 %v83_v29, %v82_v28  ;;  %v85_v33 = vld [vmem:[%s3752_s0 + $0x1d8] sm:$0xff]  ;;  %v86_v34 = vld [vmem:[%s3752_s0 + $0x1e0] sm:$0xff]  ;;  %v87_v35 = vld [vmem:[%s3752_s0 + $0x1e8] sm:$0xff] }
  0x35   :  { %v121_v36 = vpack.c.bf16 %v85_v33, %v84_v32  ;;  %v122_v37 = vpack.c.bf16 %v87_v35, %v86_v34  ;;  %v88_v38 = vld [vmem:[%s3752_s0 + $0x1f0] sm:$0xff]  ;;  %v89_v39 = vld [vmem:[%s3752_s0 + $0x1f8] sm:$0xff]  ;;  %v3078_v41 = vld [vmem:[%s3755_s3] sm:$0xff]  }
  0x36   :  { %2771 = vmatmul.mubr.msk.bf16.gmra.mrb[24].mxu0 %vm134_vm0, %v105_v50  ;;  %2825 = vmatpush3.bf16.msra.mxu1 %v3077_v19  ;;  %v123_v40 = vpack.c.bf16 %v89_v39, %v88_v38  ;;  %v3417_v45 = vld [vmem:[%s3757_s5] sm:$0xf]  ;;  %v3079_v46 = vld [vmem:[%s3755_s3 + $0x8] sm:$0xff]   ;;  %v3080_v55 = vld [vmem:[%s3755_s3 + $0x10] sm:$0xff]  }
  0x37   :  { %2774 = vmatprep.mubr.msk.bf16.mxu0 %vm134_vm0, %v106_v51  ;;  %2890 = vmatprep.subr.bf16.mxu0 %v3078_v41  ;;  %v3423_v47 = vrot.slane %v3417_v45, %v126_v44  ;;  %v3083_v8 = vld [vmem:[%s3755_s3 + $0x28] sm:$0xff]   ;;  %v3084_v15 = vld [vmem:[%s3755_s3 + $0x30] sm:$0xff]  }
  0x38   :  { %2891 = vmatpush3.bf16.msra.mxu0 %v3078_v41 }
  0x39   :  { %2892 = vmatprep.subr.bf16.mxu0 %v3079_v46 }
  0x3c   :  { %2893 = vmatpush3.bf16.msra.mxu0 %v3079_v46 }
  0x3d   :  { %2894 = vmatprep.subr.bf16.mxu0 %v3080_v55 }
  0x3e   :  { %2775 = vmatmul.mubr.msk.bf16.gmra.mrb[28].mxu0 %vm134_vm0, %v107_v56  ;;  %v3081_v56 = vld [vmem:[%s3755_s3 + $0x18] sm:$0xff]  }
  0x3f   :  { %2778 = vmatprep.mubr.msk.bf16.mxu0 %vm134_vm0, %v108_v57 }
  0x40   :  { %2895 = vmatpush3.bf16.msra.mxu0 %v3080_v55 }
  0x41   :  { %2896 = vmatprep.subr.bf16.mxu0 %v3081_v56 }
  0x44   :  { %2897 = vmatpush3.bf16.msra.mxu0 %v3081_v56 }
  0x46   :  { %2779 = vmatmul.mubr.msk.bf16.gmra.mrb[32].mxu0 %vm134_vm0, %v109_v62 }
  0x47   :  { %2782 = vmatprep.mubr.msk.bf16.mxu0 %vm134_vm0, %v110_v63  ;;  %v3082_v63 = vld [vmem:[%s3755_s3 + $0x20] sm:$0xff]  }
  0x48   :  { %2898 = vmatprep.subr.bf16.mxu0 %v3082_v63 }
  0x49   :  { %2899 = vmatpush3.bf16.msra.mxu0 %v3082_v63 }
  0x4a   :  { %2900 = vmatprep.subr.bf16.mxu0 %v3083_v8 }
  0x4d   :  { %2901 = vmatpush3.bf16.msra.mxu0 %v3083_v8 }
  0x4e   :  { %2783 = vmatmul.mubr.msk.bf16.gmra.mrb[36].mxu0 %vm134_vm0, %v111_v4  ;;  %2902 = vmatprep.subr.bf16.mxu0 %v3084_v15 }
  0x4f   :  { %2786 = vmatprep.mubr.msk.bf16.mxu0 %vm134_vm0, %v112_v5 }
  0x51   :  { %2903 = vmatpush3.bf16.msra.mxu0 %v3084_v15 }
  0x56   :  { %2787 = vmatmul.mubr.msk.bf16.gmra.mrb[40].mxu0 %vm134_vm0, %v113_v10 }
  0x57   :  { %2790 = vmatprep.mubr.msk.bf16.mxu0 %vm134_vm0, %v114_v11 }
  0x5e   :  { %2791 = vmatmul.mubr.msk.bf16.gmra.mrb[44].mxu0 %vm134_vm0, %v115_v16 }
  0x5f   :  { %2794 = vmatprep.mubr.msk.bf16.mxu0 %vm134_vm0, %v116_v18 }
  0x66   :  { %2795 = vmatmul.mubr.msk.bf16.gmra.mrb[48].mxu0 %vm134_vm0, %v117_v24  ;;  %v3085_v24 = vld [vmem:[%s3755_s3 + $0x38] sm:$0xff]  }
  0x67   :  { %2798 = vmatprep.mubr.msk.bf16.mxu0 %vm134_vm0, %v118_v25  ;;  %2904 = vmatprep.subr.bf16.mxu0 %v3085_v24 }
  0x68   :  { %2905 = vmatpush3.bf16.msra.mxu0 %v3085_v24 }
  0x6e   :  { %2799 = vmatmul.mubr.msk.bf16.gmra.mrb[52].mxu0 %vm134_vm0, %v119_v30 }
  0x6f   :  { %2802 = vmatprep.mubr.msk.bf16.mxu0 %vm134_vm0, %v120_v31 }
  0x76   :  { %2803 = vmatmul.mubr.msk.bf16.gmra.mrb[56].mxu0 %vm134_vm0, %v121_v36 }
  0x77   :  { %2806 = vmatprep.mubr.msk.bf16.mxu0 %vm134_vm0, %v122_v37 }
  0x7e   :  { %2807 = vmatmul.mubr.msk.bf16.gmra.mrb[60].mxu0 %vm134_vm0, %v123_v40 }
  0xd9   :  { %v2748_v48 = vpop.f32.mrb[0].mxu0 }
  0xda   :  { %v274_v49 = vadd.f32 %v2748_v48, %v3423_v47  ;;  %v265_v50 = vpop.f32.mrb[1].mxu0 }
  0xdb   :  { %v266_v51 = vadd.f32 %v265_v50, %v3423_v47  ;;  %v2749_v52 = vpop.f32.mrb[2].mxu0 }
  0xdc   :  { %v277_v53 = vadd.f32 %v2749_v52, %v3423_v47  ;;  %v268_v54 = vpop.f32.mrb[3].mxu0  ;;  %v522_v58 = vmax.f32 %v274_v49, 0.0 }
  0xdd   :  { %v269_v57 = vadd.f32 %v268_v54, %v3423_v47  ;;  %v520_v60 = vmax.f32 %v266_v51, 0.0 }
  0xde   :  { %v523_v59 = vmax.f32 %v277_v53, 0.0 }
  0xdf   :  { %v521_v61 = vmax.f32 %v269_v57, 0.0 }
  0xe0   :  { %v601_v62 = vpack.c.bf16 %v523_v59, %v522_v58 }
  0xe1   :  { %v2752_v0 = vpop.f32.mrb[4].mxu0  ;;  %v600_v1 = vpack.c.bf16 %v521_v61, %v520_v60 }
  0xe2   :  { %v290_v2 = vadd.f32 %v2752_v0, %v3423_v47  ;;  %v281_v3 = vpop.f32.mrb[5].mxu0 }
  0xe3   :  { %v282_v4 = vadd.f32 %v281_v3, %v3423_v47  ;;  %v2753_v5 = vpop.f32.mrb[6].mxu0  ;;  %2826 = vmatprep.mubr.bf16.mxu1 %v600_v1 }
  0xe4   :  { %v293_v6 = vadd.f32 %v2753_v5, %v3423_v47  ;;  %v284_v7 = vpop.f32.mrb[7].mxu0  ;;  %2827 = vmatmul.mubr.bf16.vlgmr.msra.gmra.mrb[0].mxu1 %v601_v62  ;;  %v526_v10 = vmax.f32 %v290_v2, 0.0 }
  0xe5   :  { %v285_v9 = vadd.f32 %v284_v7, %v3423_v47  ;;  %v524_v12 = vmax.f32 %v282_v4, 0.0 }
  0xe6   :  { %v527_v11 = vmax.f32 %v293_v6, 0.0 }
  0xe7   :  { %v525_v13 = vmax.f32 %v285_v9, 0.0 }
  0xe8   :  { %v603_v14 = vpack.c.bf16 %v527_v11, %v526_v10 }
  0xe9   :  { %v602_v16 = vpack.c.bf16 %v525_v13, %v524_v12  ;;  %v2756_v17 = vpop.f32.mrb[8].mxu0 }
  0xea   :  { %v306_v18 = vadd.f32 %v2756_v17, %v3423_v47  ;;  %v297_v19 = vpop.f32.mrb[9].mxu0 }
  0xeb   :  { %v298_v20 = vadd.f32 %v297_v19, %v3423_v47  ;;  %v2757_v21 = vpop.f32.mrb[10].mxu0  ;;  %2830 = vmatprep.mubr.bf16.mxu1 %v602_v16 }
  0xec   :  { %v309_v22 = vadd.f32 %v2757_v21, %v3423_v47  ;;  %v300_v23 = vpop.f32.mrb[11].mxu0  ;;  %2831 = vmatmul.mubr.bf16.gmra.mrb[4].mxu1 %v603_v14  ;;  %v530_v26 = vmax.f32 %v306_v18, 0.0 }
  0xed   :  { %v301_v25 = vadd.f32 %v300_v23, %v3423_v47  ;;  %v528_v28 = vmax.f32 %v298_v20, 0.0 }
  0xee   :  { %v531_v27 = vmax.f32 %v309_v22, 0.0 }
  0xef   :  { %v529_v29 = vmax.f32 %v301_v25, 0.0 }
  0xf0   :  { %v605_v30 = vpack.c.bf16 %v531_v27, %v530_v26 }
  0xf1   :  { %v604_v31 = vpack.c.bf16 %v529_v29, %v528_v28  ;;  %v2760_v32 = vpop.f32.mrb[12].mxu0 }
  0xf2   :  { %v322_v33 = vadd.f32 %v2760_v32, %v3423_v47  ;;  %v313_v34 = vpop.f32.mrb[13].mxu0 }
  0xf3   :  { %v314_v35 = vadd.f32 %v313_v34, %v3423_v47  ;;  %v2761_v36 = vpop.f32.mrb[14].mxu0  ;;  %2834 = vmatprep.mubr.bf16.mxu1 %v604_v31 }
  0xf4   :  { %v325_v37 = vadd.f32 %v2761_v36, %v3423_v47  ;;  %v316_v38 = vpop.f32.mrb[15].mxu0  ;;  %2835 = vmatmul.mubr.bf16.gmra.mrb[8].mxu1 %v605_v30  ;;  %v534_v40 = vmax.f32 %v322_v33, 0.0 }
  0xf5   :  { %v317_v39 = vadd.f32 %v316_v38, %v3423_v47  ;;  %v532_v42 = vmax.f32 %v314_v35, 0.0 }
  0xf6   :  { %v535_v41 = vmax.f32 %v325_v37, 0.0 }
  0xf7   :  { %v533_v44 = vmax.f32 %v317_v39, 0.0 }
  0xf8   :  { %v607_v46 = vpack.c.bf16 %v535_v41, %v534_v40 }
  0xf9   :  { %v606_v48 = vpack.c.bf16 %v533_v44, %v532_v42  ;;  %v2764_v49 = vpop.f32.mrb[16].mxu0 }
  0xfa   :  { %v338_v50 = vadd.f32 %v2764_v49, %v3423_v47  ;;  %v329_v51 = vpop.f32.mrb[17].mxu0 }
  0xfb   :  { %v330_v52 = vadd.f32 %v329_v51, %v3423_v47  ;;  %v2765_v53 = vpop.f32.mrb[18].mxu0  ;;  %2838 = vmatprep.mubr.bf16.mxu1 %v606_v48 }
  0xfc   :  { %v341_v54 = vadd.f32 %v2765_v53, %v3423_v47  ;;  %v332_v55 = vpop.f32.mrb[19].mxu0  ;;  %2839 = vmatmul.mubr.bf16.gmra.mrb[12].mxu1 %v607_v46  ;;  %v538_v57 = vmax.f32 %v338_v50, 0.0 }
  0xfd   :  { %v333_v56 = vadd.f32 %v332_v55, %v3423_v47  ;;  %v536_v59 = vmax.f32 %v330_v52, 0.0 }
  0xfe   :  { %v539_v58 = vmax.f32 %v341_v54, 0.0 }
  0xff   :  { %v537_v60 = vmax.f32 %v333_v56, 0.0 }
 0x100   :  { %v609_v61 = vpack.c.bf16 %v539_v58, %v538_v57 }
 0x101   :  { %v608_v62 = vpack.c.bf16 %v537_v60, %v536_v59  ;;  %v2768_v63 = vpop.f32.mrb[20].mxu0 }
 0x102   :  { %v354_v0 = vadd.f32 %v2768_v63, %v3423_v47  ;;  %v345_v1 = vpop.f32.mrb[21].mxu0 }
 0x103   :  { %v346_v2 = vadd.f32 %v345_v1, %v3423_v47  ;;  %v2769_v3 = vpop.f32.mrb[22].mxu0  ;;  %2842 = vmatprep.mubr.bf16.mxu1 %v608_v62 }
 0x104   :  { %v357_v4 = vadd.f32 %v2769_v3, %v3423_v47  ;;  %v348_v5 = vpop.f32.mrb[23].mxu0  ;;  %2843 = vmatmul.mubr.bf16.gmra.mrb[16].mxu1 %v609_v61  ;;  %v542_v7 = vmax.f32 %v354_v0, 0.0 }
 0x105   :  { %v349_v6 = vadd.f32 %v348_v5, %v3423_v47  ;;  %v540_v9 = vmax.f32 %v346_v2, 0.0 }
 0x106   :  { %v543_v8 = vmax.f32 %v357_v4, 0.0 }
 0x107   :  { %v541_v10 = vmax.f32 %v349_v6, 0.0 }
 0x108   :  { %v611_v11 = vpack.c.bf16 %v543_v8, %v542_v7 }
 0x109   :  { %v610_v12 = vpack.c.bf16 %v541_v10, %v540_v9  ;;  %v2772_v13 = vpop.f32.mrb[24].mxu0 }
 0x10a   :  { %v370_v14 = vadd.f32 %v2772_v13, %v3423_v47  ;;  %v361_v15 = vpop.f32.mrb[25].mxu0 }
 0x10b   :  { %v362_v16 = vadd.f32 %v361_v15, %v3423_v47  ;;  %v2773_v17 = vpop.f32.mrb[26].mxu0  ;;  %2846 = vmatprep.mubr.bf16.mxu1 %v610_v12 }
 0x10c   :  { %v373_v18 = vadd.f32 %v2773_v17, %v3423_v47  ;;  %v364_v19 = vpop.f32.mrb[27].mxu0  ;;  %2847 = vmatmul.mubr.bf16.gmra.mrb[20].mxu1 %v611_v11  ;;  %v546_v21 = vmax.f32 %v370_v14, 0.0 }
 0x10d   :  { %v365_v20 = vadd.f32 %v364_v19, %v3423_v47  ;;  %v544_v23 = vmax.f32 %v362_v16, 0.0 }
 0x10e   :  { %v547_v22 = vmax.f32 %v373_v18, 0.0 }
 0x10f   :  { %v545_v24 = vmax.f32 %v365_v20, 0.0 }
 0x110   :  { %v613_v25 = vpack.c.bf16 %v547_v22, %v546_v21 }
 0x111   :  { %v612_v26 = vpack.c.bf16 %v545_v24, %v544_v23  ;;  %v2776_v27 = vpop.f32.mrb[28].mxu0 }
 0x112   :  { %v386_v28 = vadd.f32 %v2776_v27, %v3423_v47  ;;  %v377_v29 = vpop.f32.mrb[29].mxu0 }
 0x113   :  { %v378_v30 = vadd.f32 %v377_v29, %v3423_v47  ;;  %v2777_v31 = vpop.f32.mrb[30].mxu0  ;;  %2850 = vmatprep.mubr.bf16.mxu1 %v612_v26 }
 0x114   :  { %v389_v32 = vadd.f32 %v2777_v31, %v3423_v47  ;;  %v380_v33 = vpop.f32.mrb[31].mxu0  ;;  %2851 = vmatmul.mubr.bf16.gmra.mrb[24].mxu1 %v613_v25  ;;  %v550_v35 = vmax.f32 %v386_v28, 0.0 }
 0x115   :  { %v381_v34 = vadd.f32 %v380_v33, %v3423_v47  ;;  %v548_v37 = vmax.f32 %v378_v30, 0.0 }
 0x116   :  { %v551_v36 = vmax.f32 %v389_v32, 0.0 }
 0x117   :  { %v549_v38 = vmax.f32 %v381_v34, 0.0 }
 0x118   :  { %v615_v39 = vpack.c.bf16 %v551_v36, %v550_v35 }
 0x119   :  { %v614_v40 = vpack.c.bf16 %v549_v38, %v548_v37  ;;  %v2780_v41 = vpop.f32.mrb[32].mxu0 }
 0x11a   :  { %v402_v42 = vadd.f32 %v2780_v41, %v3423_v47  ;;  %v393_v44 = vpop.f32.mrb[33].mxu0 }
 0x11b   :  { %v394_v46 = vadd.f32 %v393_v44, %v3423_v47  ;;  %v2781_v48 = vpop.f32.mrb[34].mxu0  ;;  %2854 = vmatprep.mubr.bf16.mxu1 %v614_v40 }
 0x11c   :  { %v405_v49 = vadd.f32 %v2781_v48, %v3423_v47  ;;  %v396_v50 = vpop.f32.mrb[35].mxu0  ;;  %2855 = vmatmul.mubr.bf16.gmra.mrb[28].mxu1 %v615_v39  ;;  %v554_v52 = vmax.f32 %v402_v42, 0.0 }
 0x11d   :  { %v397_v51 = vadd.f32 %v396_v50, %v3423_v47  ;;  %v552_v54 = vmax.f32 %v394_v46, 0.0 }
 0x11e   :  { %v555_v53 = vmax.f32 %v405_v49, 0.0 }
 0x11f   :  { %v553_v55 = vmax.f32 %v397_v51, 0.0 }
 0x120   :  { %v617_v56 = vpack.c.bf16 %v555_v53, %v554_v52 }
 0x121   :  { %v616_v57 = vpack.c.bf16 %v553_v55, %v552_v54  ;;  %v2784_v58 = vpop.f32.mrb[36].mxu0 }
 0x122   :  { %v418_v59 = vadd.f32 %v2784_v58, %v3423_v47  ;;  %v409_v60 = vpop.f32.mrb[37].mxu0 }
 0x123   :  { %v410_v61 = vadd.f32 %v409_v60, %v3423_v47  ;;  %v2785_v62 = vpop.f32.mrb[38].mxu0  ;;  %2858 = vmatprep.mubr.bf16.mxu1 %v616_v57 }
 0x124   :  { %v421_v63 = vadd.f32 %v2785_v62, %v3423_v47  ;;  %v412_v0 = vpop.f32.mrb[39].mxu0  ;;  %2859 = vmatmul.mubr.bf16.gmra.mrb[32].mxu1 %v617_v56  ;;  %v558_v2 = vmax.f32 %v418_v59, 0.0 }
 0x125   :  { %v413_v1 = vadd.f32 %v412_v0, %v3423_v47  ;;  %v556_v4 = vmax.f32 %v410_v61, 0.0 }
 0x126   :  { %v559_v3 = vmax.f32 %v421_v63, 0.0 }
 0x127   :  { %v557_v5 = vmax.f32 %v413_v1, 0.0 }
 0x128   :  { %v619_v6 = vpack.c.bf16 %v559_v3, %v558_v2 }
 0x129   :  { %v618_v7 = vpack.c.bf16 %v557_v5, %v556_v4  ;;  %v2788_v8 = vpop.f32.mrb[40].mxu0 }
 0x12a   :  { %v434_v9 = vadd.f32 %v2788_v8, %v3423_v47  ;;  %v425_v10 = vpop.f32.mrb[41].mxu0 }
 0x12b   :  { %v426_v11 = vadd.f32 %v425_v10, %v3423_v47  ;;  %v2789_v12 = vpop.f32.mrb[42].mxu0  ;;  %2862 = vmatprep.mubr.bf16.mxu1 %v618_v7 }
 0x12c   :  { %v437_v13 = vadd.f32 %v2789_v12, %v3423_v47  ;;  %v428_v14 = vpop.f32.mrb[43].mxu0  ;;  %2863 = vmatmul.mubr.bf16.gmra.mrb[36].mxu1 %v619_v6  ;;  %v562_v16 = vmax.f32 %v434_v9, 0.0 }
 0x12d   :  { %v429_v15 = vadd.f32 %v428_v14, %v3423_v47  ;;  %v560_v18 = vmax.f32 %v426_v11, 0.0 }
 0x12e   :  { %v563_v17 = vmax.f32 %v437_v13, 0.0 }
 0x12f   :  { %v561_v19 = vmax.f32 %v429_v15, 0.0 }
 0x130   :  { %v621_v20 = vpack.c.bf16 %v563_v17, %v562_v16 }
 0x131   :  { %v620_v21 = vpack.c.bf16 %v561_v19, %v560_v18  ;;  %v2792_v22 = vpop.f32.mrb[44].mxu0 }
 0x132   :  { %v450_v23 = vadd.f32 %v2792_v22, %v3423_v47  ;;  %v441_v24 = vpop.f32.mrb[45].mxu0 }
 0x133   :  { %v442_v25 = vadd.f32 %v441_v24, %v3423_v47  ;;  %v2793_v26 = vpop.f32.mrb[46].mxu0  ;;  %2866 = vmatprep.mubr.bf16.mxu1 %v620_v21 }
 0x134   :  { %v453_v27 = vadd.f32 %v2793_v26, %v3423_v47  ;;  %v444_v28 = vpop.f32.mrb[47].mxu0  ;;  %2867 = vmatmul.mubr.bf16.gmra.mrb[40].mxu1 %v621_v20  ;;  %v566_v30 = vmax.f32 %v450_v23, 0.0 }
 0x135   :  { %v445_v29 = vadd.f32 %v444_v28, %v3423_v47  ;;  %v564_v32 = vmax.f32 %v442_v25, 0.0 }
 0x136   :  { %v567_v31 = vmax.f32 %v453_v27, 0.0 }
 0x137   :  { %v565_v33 = vmax.f32 %v445_v29, 0.0 }
 0x138   :  { %v623_v34 = vpack.c.bf16 %v567_v31, %v566_v30  ;;  %v3086_v31 = vld [vmem:[%s3756_s4] sm:$0xff]  }
 0x139   :  { %v622_v35 = vpack.c.bf16 %v565_v33, %v564_v32  ;;  %v2796_v36 = vpop.f32.mrb[48].mxu0  ;;  %3050 = vmatprep.subr.bf16.mxu1 %v3086_v31  ;;  %2970 = vmatprep.subr.bf16.mxu0 %v3086_v31  ;;  %v634_v32 = vsub.s32 1, %v3411_v43 }
 0x13a   :  { %v466_v37 = vadd.f32 %v2796_v36, %v3423_v47  ;;  %v457_v38 = vpop.f32.mrb[49].mxu0  ;;  %3058 = vmatpush3.bf16.msra.mxu1 %v3086_v31 }
 0x13b   :  { %v458_v39 = vadd.f32 %v457_v38, %v3423_v47  ;;  %v2797_v40 = vpop.f32.mrb[50].mxu0  ;;  %2870 = vmatprep.mubr.bf16.mxu1 %v622_v35  ;;  %v3512_v33 = vrot.slane %v3417_v45, %v634_v32  ;;  %v3088_v45 = vld [vmem:[%s3756_s4 + $0x10] sm:$0xff]  }
 0x13c   :  { %v469_v41 = vadd.f32 %v2797_v40, %v3423_v47  ;;  %v460_v42 = vpop.f32.mrb[51].mxu0  ;;  %2871 = vmatmul.mubr.bf16.gmra.mrb[44].mxu1 %v623_v34  ;;  %v570_v46 = vmax.f32 %v466_v37, 0.0  ;;  %v3087_v34 = vld [vmem:[%s3756_s4 + $0x8] sm:$0xff]  }
 0x13d   :  { %v461_v44 = vadd.f32 %v460_v42, %v3423_v47  ;;  %v568_v49 = vmax.f32 %v458_v39, 0.0  ;;  %3051 = vmatprep.subr.bf16.mxu1 %v3087_v34 }
 0x13e   :  { %v571_v48 = vmax.f32 %v469_v41, 0.0  ;;  %3059 = vmatpush3.bf16.msra.mxu1 %v3087_v34 }
 0x13f   :  { %v569_v50 = vmax.f32 %v461_v44, 0.0  ;;  %3052 = vmatprep.subr.bf16.mxu1 %v3088_v45 }
 0x140   :  { %v625_v51 = vpack.c.bf16 %v571_v48, %v570_v46 }
 0x141   :  { %v624_v52 = vpack.c.bf16 %v569_v50, %v568_v49  ;;  %v2800_v53 = vpop.f32.mrb[52].mxu0  ;;  %v3089_v49 = vld [vmem:[%s3756_s4 + $0x18] sm:$0xff]  }
 0x142   :  { %v482_v54 = vadd.f32 %v2800_v53, %v3423_v47  ;;  %v473_v55 = vpop.f32.mrb[53].mxu0  ;;  %3060 = vmatpush3.bf16.msra.mxu1 %v3088_v45 }
 0x143   :  { %v474_v56 = vadd.f32 %v473_v55, %v3423_v47  ;;  %v2801_v57 = vpop.f32.mrb[54].mxu0  ;;  %2874 = vmatprep.mubr.bf16.mxu1 %v624_v52  ;;  %3053 = vmatprep.subr.bf16.mxu1 %v3089_v49 }
 0x144   :  { %v485_v58 = vadd.f32 %v2801_v57, %v3423_v47  ;;  %v476_v59 = vpop.f32.mrb[55].mxu0  ;;  %2875 = vmatmul.mubr.bf16.gmra.mrb[48].mxu1 %v625_v51  ;;  %v574_v61 = vmax.f32 %v482_v54, 0.0  ;;  %v3090_v57 = vld [vmem:[%s3756_s4 + $0x20] sm:$0xff]  }
 0x145   :  { %v477_v60 = vadd.f32 %v476_v59, %v3423_v47  ;;  %v572_v63 = vmax.f32 %v474_v56, 0.0 }
 0x146   :  { %v575_v62 = vmax.f32 %v485_v58, 0.0  ;;  %3061 = vmatpush3.bf16.msra.mxu1 %v3089_v49 }
 0x147   :  { %v573_v0 = vmax.f32 %v477_v60, 0.0  ;;  %3054 = vmatprep.subr.bf16.mxu1 %v3090_v57 }
 0x148   :  { %v627_v1 = vpack.c.bf16 %v575_v62, %v574_v61 }
 0x149   :  { %v626_v2 = vpack.c.bf16 %v573_v0, %v572_v63  ;;  %v2804_v3 = vpop.f32.mrb[56].mxu0 }
 0x14a   :  { %v498_v4 = vadd.f32 %v2804_v3, %v3423_v47  ;;  %v489_v5 = vpop.f32.mrb[57].mxu0  ;;  %3062 = vmatpush3.bf16.msra.mxu1 %v3090_v57 }
 0x14b   :  { %v490_v6 = vadd.f32 %v489_v5, %v3423_v47  ;;  %v2805_v7 = vpop.f32.mrb[58].mxu0  ;;  %2878 = vmatprep.mubr.bf16.mxu1 %v626_v2 }
 0x14c   :  { %v501_v8 = vadd.f32 %v2805_v7, %v3423_v47  ;;  %v492_v9 = vpop.f32.mrb[59].mxu0  ;;  %2879 = vmatmul.mubr.bf16.gmra.mrb[52].mxu1 %v627_v1  ;;  %v578_v11 = vmax.f32 %v498_v4, 0.0  ;;  %v3091_v1 = vld [vmem:[%s3756_s4 + $0x28] sm:$0xff]  }
 0x14d   :  { %v493_v10 = vadd.f32 %v492_v9, %v3423_v47  ;;  %v576_v13 = vmax.f32 %v490_v6, 0.0  ;;  %3055 = vmatprep.subr.bf16.mxu1 %v3091_v1  ;;  %v3092_v9 = vld [vmem:[%s3756_s4 + $0x30] sm:$0xff]  }
 0x14e   :  { %v579_v12 = vmax.f32 %v501_v8, 0.0  ;;  %3063 = vmatpush3.bf16.msra.mxu1 %v3091_v1 }
 0x14f   :  { %v577_v14 = vmax.f32 %v493_v10, 0.0  ;;  %3056 = vmatprep.subr.bf16.mxu1 %v3092_v9 }
 0x150   :  { %v629_v15 = vpack.c.bf16 %v579_v12, %v578_v11 }
 0x151   :  { %v628_v16 = vpack.c.bf16 %v577_v14, %v576_v13  ;;  %v2808_v17 = vpop.f32.mrb[60].mxu0 }
 0x152   :  { %v514_v18 = vadd.f32 %v2808_v17, %v3423_v47  ;;  %v505_v19 = vpop.f32.mrb[61].mxu0  ;;  %3064 = vmatpush3.bf16.msra.mxu1 %v3092_v9 }
 0x153   :  { %v506_v20 = vadd.f32 %v505_v19, %v3423_v47  ;;  %v2809_v21 = vpop.f32.mrb[62].mxu0  ;;  %2882 = vmatprep.mubr.bf16.mxu1 %v628_v16 }
 0x154   :  { %v517_v22 = vadd.f32 %v2809_v21, %v3423_v47  ;;  %v508_v23 = vpop.f32.mrb[63].mxu0  ;;  %2883 = vmatmul.mubr.bf16.gmra.mrb[56].mxu1 %v629_v15  ;;  %v582_v25 = vmax.f32 %v514_v18, 0.0 }
 0x155   :  { %v509_v24 = vadd.f32 %v508_v23, %v3423_v47  ;;  %v580_v27 = vmax.f32 %v506_v20, 0.0 }
 0x156   :  { %v583_v26 = vmax.f32 %v517_v22, 0.0 }
 0x157   :  { %v581_v28 = vmax.f32 %v509_v24, 0.0 }
 0x158   :  { %v631_v29 = vpack.c.bf16 %v583_v26, %v582_v25 }
 0x159   :  { %v630_v30 = vpack.c.bf16 %v581_v28, %v580_v27 }
 0x15b   :  { %2886 = vmatprep.mubr.bf16.mxu1 %v630_v30 }
 0x15c   :  { %2887 = vmatmul.mubr.bf16.gmra.mrb[60].mxu1 %v631_v29 }
 0x1b7   :  { %v2828_v47 = vpop.f32.mrb[0].mxu1 }
 0x1b8   :  { %v727_v35 = vadd.f32 %v2828_v47, %v3512_v33  ;;  %v718_v36 = vpop.f32.mrb[1].mxu1 }
 0x1b9   :  { %v719_v37 = vadd.f32 %v718_v36, %v3512_v33  ;;  %v2829_v38 = vpop.f32.mrb[2].mxu1 }
 0x1ba   :  { %v730_v39 = vadd.f32 %v2829_v38, %v3512_v33  ;;  %v721_v40 = vpop.f32.mrb[3].mxu1  ;;  %v975_v42 = vmax.f32 %v727_v35, 0.0 }
 0x1bb   :  { %v722_v41 = vadd.f32 %v721_v40, %v3512_v33  ;;  %v973_v46 = vmax.f32 %v719_v37, 0.0 }
 0x1bc   :  { %v976_v44 = vmax.f32 %v730_v39, 0.0 }
 0x1bd   :  { %v974_v48 = vmax.f32 %v722_v41, 0.0 }
 0x1be   :  { %v1054_v50 = vpack.c.bf16 %v976_v44, %v975_v42 }
 0x1bf   :  { %v1053_v51 = vpack.c.bf16 %v974_v48, %v973_v46  ;;  %v2832_v52 = vpop.f32.mrb[4].mxu1 }
 0x1c0   :  { %v743_v53 = vadd.f32 %v2832_v52, %v3512_v33  ;;  %v734_v54 = vpop.f32.mrb[5].mxu1 }
 0x1c1   :  { %v735_v55 = vadd.f32 %v734_v54, %v3512_v33  ;;  %v2833_v56 = vpop.f32.mrb[6].mxu1  ;;  %2906 = vmatprep.mubr.bf16.mxu0 %v1053_v51 }
 0x1c2   :  { %v746_v58 = vadd.f32 %v2833_v56, %v3512_v33  ;;  %v737_v59 = vpop.f32.mrb[7].mxu1  ;;  %2907 = vmatmul.mubr.bf16.vlgmr.msra.gmra.mrb[64].mxu0 %v1054_v50  ;;  %v979_v61 = vmax.f32 %v743_v53, 0.0 }
 0x1c3   :  { %v738_v60 = vadd.f32 %v737_v59, %v3512_v33  ;;  %2971 = vmatpush3.bf16.msra.mxu0 %v3086_v31  ;;  %v977_v63 = vmax.f32 %v735_v55, 0.0 }
 0x1c4   :  { %v980_v62 = vmax.f32 %v746_v58, 0.0  ;;  %2972 = vmatprep.subr.bf16.mxu0 %v3087_v34 }
 0x1c5   :  { %v978_v0 = vmax.f32 %v738_v60, 0.0 }
 0x1c6   :  { %v1056_v2 = vpack.c.bf16 %v980_v62, %v979_v61 }
 0x1c7   :  { %v1055_v3 = vpack.c.bf16 %v978_v0, %v977_v63  ;;  %v2836_v4 = vpop.f32.mrb[8].mxu1  ;;  %2973 = vmatpush3.bf16.msra.mxu0 %v3087_v34 }
 0x1c8   :  { %v759_v5 = vadd.f32 %v2836_v4, %v3512_v33  ;;  %v750_v6 = vpop.f32.mrb[9].mxu1  ;;  %2974 = vmatprep.subr.bf16.mxu0 %v3088_v45 }
 0x1c9   :  { %v751_v7 = vadd.f32 %v750_v6, %v3512_v33  ;;  %v2837_v8 = vpop.f32.mrb[10].mxu1  ;;  %2910 = vmatprep.mubr.bf16.mxu0 %v1055_v3 }
 0x1ca   :  { %v762_v10 = vadd.f32 %v2837_v8, %v3512_v33  ;;  %v753_v11 = vpop.f32.mrb[11].mxu1  ;;  %2911 = vmatmul.mubr.bf16.gmra.mrb[68].mxu0 %v1056_v2  ;;  %v983_v13 = vmax.f32 %v759_v5, 0.0 }
 0x1cb   :  { %v754_v12 = vadd.f32 %v753_v11, %v3512_v33  ;;  %2975 = vmatpush3.bf16.msra.mxu0 %v3088_v45  ;;  %v981_v15 = vmax.f32 %v751_v7, 0.0 }
 0x1cc   :  { %v984_v14 = vmax.f32 %v762_v10, 0.0  ;;  %2976 = vmatprep.subr.bf16.mxu0 %v3089_v49 }
 0x1cd   :  { %v982_v16 = vmax.f32 %v754_v12, 0.0 }
 0x1ce   :  { %v1058_v17 = vpack.c.bf16 %v984_v14, %v983_v13 }
 0x1cf   :  { %v1057_v18 = vpack.c.bf16 %v982_v16, %v981_v15  ;;  %v2840_v19 = vpop.f32.mrb[12].mxu1  ;;  %2977 = vmatpush3.bf16.msra.mxu0 %v3089_v49 }
 0x1d0   :  { %v775_v20 = vadd.f32 %v2840_v19, %v3512_v33  ;;  %v766_v21 = vpop.f32.mrb[13].mxu1  ;;  %2978 = vmatprep.subr.bf16.mxu0 %v3090_v57 }
 0x1d1   :  { %v767_v22 = vadd.f32 %v766_v21, %v3512_v33  ;;  %v2841_v23 = vpop.f32.mrb[14].mxu1  ;;  %2914 = vmatprep.mubr.bf16.mxu0 %v1057_v18 }
 0x1d2   :  { %v778_v24 = vadd.f32 %v2841_v23, %v3512_v33  ;;  %v769_v25 = vpop.f32.mrb[15].mxu1  ;;  %2915 = vmatmul.mubr.bf16.gmra.mrb[72].mxu0 %v1058_v17  ;;  %v987_v27 = vmax.f32 %v775_v20, 0.0 }
 0x1d3   :  { %v770_v26 = vadd.f32 %v769_v25, %v3512_v33  ;;  %2979 = vmatpush3.bf16.msra.mxu0 %v3090_v57  ;;  %v985_v29 = vmax.f32 %v767_v22, 0.0 }
 0x1d4   :  { %v988_v28 = vmax.f32 %v778_v24, 0.0  ;;  %2980 = vmatprep.subr.bf16.mxu0 %v3091_v1 }
 0x1d5   :  { %v986_v30 = vmax.f32 %v770_v26, 0.0 }
 0x1d6   :  { %v1060_v31 = vpack.c.bf16 %v988_v28, %v987_v27 }
 0x1d7   :  { %v1059_v32 = vpack.c.bf16 %v986_v30, %v985_v29  ;;  %v2844_v47 = vpop.f32.mrb[16].mxu1  ;;  %2981 = vmatpush3.bf16.msra.mxu0 %v3091_v1 }
 0x1d8   :  { %v791_v34 = vadd.f32 %v2844_v47, %v3512_v33  ;;  %v782_v35 = vpop.f32.mrb[17].mxu1  ;;  %2982 = vmatprep.subr.bf16.mxu0 %v3092_v9 }
 0x1d9   :  { %v783_v36 = vadd.f32 %v782_v35, %v3512_v33  ;;  %v2845_v37 = vpop.f32.mrb[18].mxu1  ;;  %2918 = vmatprep.mubr.bf16.mxu0 %v1059_v32 }
 0x1da   :  { %v794_v38 = vadd.f32 %v2845_v37, %v3512_v33  ;;  %v785_v39 = vpop.f32.mrb[19].mxu1  ;;  %2919 = vmatmul.mubr.bf16.gmra.mrb[76].mxu0 %v1060_v31  ;;  %v991_v45 = vmax.f32 %v791_v34, 0.0 }
 0x1db   :  { %v786_v40 = vadd.f32 %v785_v39, %v3512_v33  ;;  %2983 = vmatpush3.bf16.msra.mxu0 %v3092_v9  ;;  %v989_v42 = vmax.f32 %v783_v36, 0.0 }
 0x1dc   :  { %v992_v41 = vmax.f32 %v794_v38, 0.0 }
 0x1dd   :  { %v990_v44 = vmax.f32 %v786_v40, 0.0 }
 0x1de   :  { %v1062_v46 = vpack.c.bf16 %v992_v41, %v991_v45 }
 0x1df   :  { %v1061_v48 = vpack.c.bf16 %v990_v44, %v989_v42  ;;  %v2848_v49 = vpop.f32.mrb[20].mxu1 }
 0x1e0   :  { %v807_v50 = vadd.f32 %v2848_v49, %v3512_v33  ;;  %v798_v51 = vpop.f32.mrb[21].mxu1 }
 0x1e1   :  { %v799_v52 = vadd.f32 %v798_v51, %v3512_v33  ;;  %v2849_v53 = vpop.f32.mrb[22].mxu1  ;;  %2922 = vmatprep.mubr.bf16.mxu0 %v1061_v48 }
 0x1e2   :  { %v810_v54 = vadd.f32 %v2849_v53, %v3512_v33  ;;  %v801_v55 = vpop.f32.mrb[23].mxu1  ;;  %2923 = vmatmul.mubr.bf16.gmra.mrb[80].mxu0 %v1062_v46  ;;  %v995_v57 = vmax.f32 %v807_v50, 0.0 }
 0x1e3   :  { %v802_v56 = vadd.f32 %v801_v55, %v3512_v33  ;;  %v993_v59 = vmax.f32 %v799_v52, 0.0 }
 0x1e4   :  { %v996_v58 = vmax.f32 %v810_v54, 0.0 }
 0x1e5   :  { %v994_v60 = vmax.f32 %v802_v56, 0.0 }
 0x1e6   :  { %v1064_v61 = vpack.c.bf16 %v996_v58, %v995_v57 }
 0x1e7   :  { %v1063_v62 = vpack.c.bf16 %v994_v60, %v993_v59  ;;  %v2852_v63 = vpop.f32.mrb[24].mxu1 }
 0x1e8   :  { %v823_v0 = vadd.f32 %v2852_v63, %v3512_v33  ;;  %v814_v1 = vpop.f32.mrb[25].mxu1 }
 0x1e9   :  { %v815_v2 = vadd.f32 %v814_v1, %v3512_v33  ;;  %v2853_v3 = vpop.f32.mrb[26].mxu1  ;;  %2926 = vmatprep.mubr.bf16.mxu0 %v1063_v62 }
 0x1ea   :  { %v826_v4 = vadd.f32 %v2853_v3, %v3512_v33  ;;  %v817_v5 = vpop.f32.mrb[27].mxu1  ;;  %2927 = vmatmul.mubr.bf16.gmra.mrb[84].mxu0 %v1064_v61  ;;  %v999_v7 = vmax.f32 %v823_v0, 0.0 }
 0x1eb   :  { %v818_v6 = vadd.f32 %v817_v5, %v3512_v33  ;;  %v997_v9 = vmax.f32 %v815_v2, 0.0 }
 0x1ec   :  { %v1000_v8 = vmax.f32 %v826_v4, 0.0 }
 0x1ed   :  { %v998_v10 = vmax.f32 %v818_v6, 0.0 }
 0x1ee   :  { %v1066_v11 = vpack.c.bf16 %v1000_v8, %v999_v7 }
 0x1ef   :  { %v1065_v12 = vpack.c.bf16 %v998_v10, %v997_v9  ;;  %v2856_v13 = vpop.f32.mrb[28].mxu1 }
 0x1f0   :  { %v839_v14 = vadd.f32 %v2856_v13, %v3512_v33  ;;  %v830_v15 = vpop.f32.mrb[29].mxu1 }
 0x1f1   :  { %v831_v16 = vadd.f32 %v830_v15, %v3512_v33  ;;  %v2857_v17 = vpop.f32.mrb[30].mxu1  ;;  %2930 = vmatprep.mubr.bf16.mxu0 %v1065_v12 }
 0x1f2   :  { %v842_v18 = vadd.f32 %v2857_v17, %v3512_v33  ;;  %v833_v19 = vpop.f32.mrb[31].mxu1  ;;  %2931 = vmatmul.mubr.bf16.gmra.mrb[88].mxu0 %v1066_v11  ;;  %v1003_v21 = vmax.f32 %v839_v14, 0.0 }
 0x1f3   :  { %v834_v20 = vadd.f32 %v833_v19, %v3512_v33  ;;  %v1001_v23 = vmax.f32 %v831_v16, 0.0 }
 0x1f4   :  { %v1004_v22 = vmax.f32 %v842_v18, 0.0 }
 0x1f5   :  { %v1002_v24 = vmax.f32 %v834_v20, 0.0 }
 0x1f6   :  { %v1068_v25 = vpack.c.bf16 %v1004_v22, %v1003_v21 }
 0x1f7   :  { %v1067_v26 = vpack.c.bf16 %v1002_v24, %v1001_v23  ;;  %v2860_v27 = vpop.f32.mrb[32].mxu1 }
 0x1f8   :  { %v855_v28 = vadd.f32 %v2860_v27, %v3512_v33  ;;  %v846_v29 = vpop.f32.mrb[33].mxu1 }
 0x1f9   :  { %v847_v30 = vadd.f32 %v846_v29, %v3512_v33  ;;  %v2861_v31 = vpop.f32.mrb[34].mxu1  ;;  %2934 = vmatprep.mubr.bf16.mxu0 %v1067_v26 }
 0x1fa   :  { %v858_v32 = vadd.f32 %v2861_v31, %v3512_v33  ;;  %v849_v47 = vpop.f32.mrb[35].mxu1  ;;  %2935 = vmatmul.mubr.bf16.gmra.mrb[92].mxu0 %v1068_v25  ;;  %v1007_v35 = vmax.f32 %v855_v28, 0.0  ;;  %v3093_v28 = vld [vmem:[%s3756_s4 + $0x38] sm:$0xff]  }
 0x1fb   :  { %v850_v34 = vadd.f32 %v849_v47, %v3512_v33  ;;  %v1005_v37 = vmax.f32 %v847_v30, 0.0  ;;  %3057 = vmatprep.subr.bf16.mxu1 %v3093_v28  ;;  %2984 = vmatprep.subr.bf16.mxu0 %v3093_v28 }
 0x1fc   :  { %v1008_v36 = vmax.f32 %v858_v32, 0.0  ;;  %3065 = vmatpush3.bf16.msra.mxu1 %v3093_v28  ;;  %2985 = vmatpush3.bf16.msra.mxu0 %v3093_v28 }
 0x1fd   :  { %v1006_v38 = vmax.f32 %v850_v34, 0.0 }
 0x1fe   :  { %v1070_v39 = vpack.c.bf16 %v1008_v36, %v1007_v35 }
 0x1ff   :  { %v1069_v40 = vpack.c.bf16 %v1006_v38, %v1005_v37  ;;  %v2864_v45 = vpop.f32.mrb[36].mxu1 }
 0x200   :  { %v871_v41 = vadd.f32 %v2864_v45, %v3512_v33  ;;  %v862_v42 = vpop.f32.mrb[37].mxu1 }
 0x201   :  { %v863_v44 = vadd.f32 %v862_v42, %v3512_v33  ;;  %v2865_v46 = vpop.f32.mrb[38].mxu1  ;;  %2938 = vmatprep.mubr.bf16.mxu0 %v1069_v40 }
 0x202   :  { %v874_v48 = vadd.f32 %v2865_v46, %v3512_v33  ;;  %v865_v49 = vpop.f32.mrb[39].mxu1  ;;  %2939 = vmatmul.mubr.bf16.gmra.mrb[96].mxu0 %v1070_v39  ;;  %v1011_v51 = vmax.f32 %v871_v41, 0.0 }
 0x203   :  { %v866_v50 = vadd.f32 %v865_v49, %v3512_v33  ;;  %v1009_v53 = vmax.f32 %v863_v44, 0.0 }
 0x204   :  { %v1012_v52 = vmax.f32 %v874_v48, 0.0 }
 0x205   :  { %v1010_v54 = vmax.f32 %v866_v50, 0.0 }
 0x206   :  { %v1072_v55 = vpack.c.bf16 %v1012_v52, %v1011_v51 }
 0x207   :  { %v1071_v56 = vpack.c.bf16 %v1010_v54, %v1009_v53  ;;  %v2868_v57 = vpop.f32.mrb[40].mxu1 }
 0x208   :  { %v887_v58 = vadd.f32 %v2868_v57, %v3512_v33  ;;  %v878_v59 = vpop.f32.mrb[41].mxu1 }
 0x209   :  { %v879_v60 = vadd.f32 %v878_v59, %v3512_v33  ;;  %v2869_v61 = vpop.f32.mrb[42].mxu1  ;;  %2942 = vmatprep.mubr.bf16.mxu0 %v1071_v56 }
 0x20a   :  { %v890_v62 = vadd.f32 %v2869_v61, %v3512_v33  ;;  %v881_v63 = vpop.f32.mrb[43].mxu1  ;;  %2943 = vmatmul.mubr.bf16.gmra.mrb[100].mxu0 %v1072_v55  ;;  %v1015_v1 = vmax.f32 %v887_v58, 0.0 }
 0x20b   :  { %v882_v0 = vadd.f32 %v881_v63, %v3512_v33  ;;  %v1013_v3 = vmax.f32 %v879_v60, 0.0 }
 0x20c   :  { %v1016_v2 = vmax.f32 %v890_v62, 0.0 }
 0x20d   :  { %v1014_v4 = vmax.f32 %v882_v0, 0.0 }
 0x20e   :  { %v1074_v5 = vpack.c.bf16 %v1016_v2, %v1015_v1 }
 0x20f   :  { %v1073_v6 = vpack.c.bf16 %v1014_v4, %v1013_v3  ;;  %v2872_v7 = vpop.f32.mrb[44].mxu1 }
 0x210   :  { %v903_v8 = vadd.f32 %v2872_v7, %v3512_v33  ;;  %v894_v9 = vpop.f32.mrb[45].mxu1 }
 0x211   :  { %v895_v10 = vadd.f32 %v894_v9, %v3512_v33  ;;  %v2873_v11 = vpop.f32.mrb[46].mxu1  ;;  %2946 = vmatprep.mubr.bf16.mxu0 %v1073_v6 }
 0x212   :  { %v906_v12 = vadd.f32 %v2873_v11, %v3512_v33  ;;  %v897_v13 = vpop.f32.mrb[47].mxu1  ;;  %2947 = vmatmul.mubr.bf16.gmra.mrb[104].mxu0 %v1074_v5  ;;  %v1019_v15 = vmax.f32 %v903_v8, 0.0 }
 0x213   :  { %v898_v14 = vadd.f32 %v897_v13, %v3512_v33  ;;  %v1017_v17 = vmax.f32 %v895_v10, 0.0 }
 0x214   :  { %v1020_v16 = vmax.f32 %v906_v12, 0.0 }
 0x215   :  { %v1018_v18 = vmax.f32 %v898_v14, 0.0 }
 0x216   :  { %v1076_v19 = vpack.c.bf16 %v1020_v16, %v1019_v15  ;;  %v1087_v16 = vsub.s32 2, %v3411_v43 }
 0x217   :  { %v1075_v20 = vpack.c.bf16 %v1018_v18, %v1017_v17  ;;  %v2876_v21 = vpop.f32.mrb[48].mxu1  ;;  %v3603_v17 = vld [vmem:[%s3757_s5] sm:$0xf]  ;;  %s3119_s5 = smov [#allocation2]  }
 0x218   :  { %v919_v22 = vadd.f32 %v2876_v21, %v3512_v33  ;;  %v910_v23 = vpop.f32.mrb[49].mxu1  ;;  %v3606_v18 = vrot.slane %v3603_v17, %v1087_v16  ;;  %s2204_s2 = sshll.u32 %s3119_s5, 4  ;;  %s2205_s2 = int_to_ptr.vmem [resolvable:$true] %s2204_s2 }
 0x219   :  { %v911_v24 = vadd.f32 %v910_v23, %v3512_v33  ;;  %v2877_v25 = vpop.f32.mrb[50].mxu1  ;;  %2950 = vmatprep.mubr.bf16.mxu0 %v1075_v20  ;;  %s3095_s22 = scalar_lea.vmem %s2205_s2, 4096  ;;  %p3100_p1 = scmp.lt.s32.totalorder %s2205_s2, %s2205_s2 }
 0x21a   :  { %v922_v26 = vadd.f32 %v2877_v25, %v3512_v33  ;;  %v913_v27 = vpop.f32.mrb[51].mxu1  ;;  %2951 = vmatmul.mubr.bf16.gmra.mrb[108].mxu0 %v1076_v19  ;;  %v1023_v30 = vmax.f32 %v919_v22, 0.0  ;;  %p3096_p0 = scmp.ne.s32.totalorder %s2205_s2, %s3095_s22  ;;  %p3101_p2 = scmp.lt.s32.totalorder %s3095_s22, %s3095_s22 }
 0x21b   :  { %v914_v29 = vadd.f32 %v913_v27, %v3512_v33  ;;  %v1021_v32 = vmax.f32 %v911_v24, 0.0 }
 0x21c   :  { %v1024_v31 = vmax.f32 %v922_v26, 0.0  ;;  %p3102_p3 = por %p3101_p2, %p3100_p1 }
 0x21d   :  { %v1022_v47 = vmax.f32 %v914_v29, 0.0 }
 0x21e   :  { %v1078_v34 = vpack.c.bf16 %v1024_v31, %v1023_v30  ;;  %p3103_p4 = pnand %p3102_p3, %p3096_p0 }
 0x21f   :  { %v1077_v35 = vpack.c.bf16 %v1022_v47, %v1021_v32  ;;  %v2880_v36 = vpop.f32.mrb[52].mxu1 }
 0x220   :  { %v935_v37 = vadd.f32 %v2880_v36, %v3512_v33  ;;  %v926_v38 = vpop.f32.mrb[53].mxu1 }
 0x221   :  { %v927_v39 = vadd.f32 %v926_v38, %v3512_v33  ;;  %v2881_v40 = vpop.f32.mrb[54].mxu1  ;;  %2954 = vmatprep.mubr.bf16.mxu0 %v1077_v35 }
 0x222   :  { %v938_v45 = vadd.f32 %v2881_v40, %v3512_v33  ;;  %v929_v41 = vpop.f32.mrb[55].mxu1  ;;  %2955 = vmatmul.mubr.bf16.gmra.mrb[112].mxu0 %v1078_v34  ;;  %v1027_v44 = vmax.f32 %v935_v37, 0.0 }
 0x223   :  { %v930_v42 = vadd.f32 %v929_v41, %v3512_v33  ;;  %v1025_v48 = vmax.f32 %v927_v39, 0.0 }
 0x224   :  { %v1028_v46 = vmax.f32 %v938_v45, 0.0 }
 0x225   :  { %v1026_v49 = vmax.f32 %v930_v42, 0.0 }
 0x226   :  { %v1080_v50 = vpack.c.bf16 %v1028_v46, %v1027_v44 }
 0x227   :  { %v1079_v51 = vpack.c.bf16 %v1026_v49, %v1025_v48  ;;  %v2884_v52 = vpop.f32.mrb[56].mxu1 }
 0x228   :  { %v951_v53 = vadd.f32 %v2884_v52, %v3512_v33  ;;  %v942_v54 = vpop.f32.mrb[57].mxu1 }
 0x229   :  { %v943_v55 = vadd.f32 %v942_v54, %v3512_v33  ;;  %v2885_v56 = vpop.f32.mrb[58].mxu1  ;;  %2958 = vmatprep.mubr.bf16.mxu0 %v1079_v51 }
 0x22a   :  { %v954_v57 = vadd.f32 %v2885_v56, %v3512_v33  ;;  %v945_v58 = vpop.f32.mrb[59].mxu1  ;;  %2959 = vmatmul.mubr.bf16.gmra.mrb[116].mxu0 %v1080_v50  ;;  %v1031_v60 = vmax.f32 %v951_v53, 0.0 }
 0x22b   :  { %v946_v59 = vadd.f32 %v945_v58, %v3512_v33  ;;  %v1029_v62 = vmax.f32 %v943_v55, 0.0 }
 0x22c   :  { %v1032_v61 = vmax.f32 %v954_v57, 0.0 }
 0x22d   :  { %v1030_v63 = vmax.f32 %v946_v59, 0.0 }
 0x22e   :  { %v1082_v0 = vpack.c.bf16 %v1032_v61, %v1031_v60 }
 0x22f   :  { %v1081_v1 = vpack.c.bf16 %v1030_v63, %v1029_v62  ;;  %v2888_v2 = vpop.f32.mrb[60].mxu1 }
 0x230   :  { %v967_v3 = vadd.f32 %v2888_v2, %v3512_v33  ;;  %v958_v4 = vpop.f32.mrb[61].mxu1 }
 0x231   :  { %v959_v5 = vadd.f32 %v958_v4, %v3512_v33  ;;  %v2889_v6 = vpop.f32.mrb[62].mxu1  ;;  %2962 = vmatprep.mubr.bf16.mxu0 %v1081_v1 }
 0x232   :  { %v970_v7 = vadd.f32 %v2889_v6, %v3512_v33  ;;  %v961_v8 = vpop.f32.mrb[63].mxu1  ;;  %2963 = vmatmul.mubr.bf16.gmra.mrb[120].mxu0 %v1082_v0  ;;  %v1035_v10 = vmax.f32 %v967_v3, 0.0 }
 0x233   :  { %v962_v9 = vadd.f32 %v961_v8, %v3512_v33  ;;  %v1033_v12 = vmax.f32 %v959_v5, 0.0 }
 0x234   :  { %v1036_v11 = vmax.f32 %v970_v7, 0.0 }
 0x235   :  { %v1034_v13 = vmax.f32 %v962_v9, 0.0 }
 0x236   :  { %v1084_v14 = vpack.c.bf16 %v1036_v11, %v1035_v10 }
 0x237   :  { %v1083_v15 = vpack.c.bf16 %v1034_v13, %v1033_v12 }
 0x239   :  { %2966 = vmatprep.mubr.bf16.mxu0 %v1083_v15 }
 0x23a   :  { %2967 = vmatmul.mubr.bf16.gmra.mrb[124].mxu0 %v1084_v14 }
 0x295   :  { %v2908_v19 = vpop.f32.mrb[64].mxu0 }
 0x296   :  { %v1180_v33 = vadd.f32 %v2908_v19, %v3606_v18  ;;  %v1171_v20 = vpop.f32.mrb[65].mxu0 }
 0x297   :  { %v1172_v21 = vadd.f32 %v1171_v20, %v3606_v18  ;;  %v2909_v22 = vpop.f32.mrb[66].mxu0 }
 0x298   :  { %v1183_v23 = vadd.f32 %v2909_v22, %v3606_v18  ;;  %v1174_v24 = vpop.f32.mrb[67].mxu0  ;;  %v1428_v26 = vmax.f32 %v1180_v33, 0.0 }
 0x299   :  { %v1175_v25 = vadd.f32 %v1174_v24, %v3606_v18  ;;  %v1426_v28 = vmax.f32 %v1172_v21, 0.0 }
 0x29a   :  { %v1429_v27 = vmax.f32 %v1183_v23, 0.0 }
 0x29b   :  { %v1427_v29 = vmax.f32 %v1175_v25, 0.0 }
 0x29c   :  { %v1507_v30 = vpack.c.bf16 %v1429_v27, %v1428_v26 }
 0x29d   :  { %v1506_v31 = vpack.c.bf16 %v1427_v29, %v1426_v28  ;;  %v2912_v32 = vpop.f32.mrb[68].mxu0 }
 0x29e   :  { %v1196_v47 = vadd.f32 %v2912_v32, %v3606_v18  ;;  %v1187_v34 = vpop.f32.mrb[69].mxu0 }
 0x29f   :  { %v1188_v35 = vadd.f32 %v1187_v34, %v3606_v18  ;;  %v2913_v36 = vpop.f32.mrb[70].mxu0  ;;  %2986 = vmatprep.mubr.bf16.mxu0 %v1506_v31 }
 0x2a0   :  { %v1199_v37 = vadd.f32 %v2913_v36, %v3606_v18  ;;  %v1190_v38 = vpop.f32.mrb[71].mxu0  ;;  %2987 = vmatmul.mubr.bf16.vlgmr.msra.gmra.mrb[128].mxu0 %v1507_v30  ;;  %v1432_v40 = vmax.f32 %v1196_v47, 0.0 }
 0x2a1   :  { %v1191_v39 = vadd.f32 %v1190_v38, %v3606_v18  ;;  %v1430_v41 = vmax.f32 %v1188_v35, 0.0 }
 0x2a2   :  { %v1433_v45 = vmax.f32 %v1199_v37, 0.0 }
 0x2a3   :  { %v1431_v42 = vmax.f32 %v1191_v39, 0.0 }
 0x2a4   :  { %v1509_v44 = vpack.c.bf16 %v1433_v45, %v1432_v40 }
 0x2a5   :  { %v1508_v46 = vpack.c.bf16 %v1431_v42, %v1430_v41  ;;  %v2916_v48 = vpop.f32.mrb[72].mxu0 }
 0x2a6   :  { %v1212_v49 = vadd.f32 %v2916_v48, %v3606_v18  ;;  %v1203_v50 = vpop.f32.mrb[73].mxu0 }
 0x2a7   :  { %v1204_v51 = vadd.f32 %v1203_v50, %v3606_v18  ;;  %v2917_v52 = vpop.f32.mrb[74].mxu0  ;;  %2990 = vmatprep.mubr.bf16.mxu1 %v1508_v46 }
 0x2a8   :  { %v1215_v53 = vadd.f32 %v2917_v52, %v3606_v18  ;;  %v1206_v54 = vpop.f32.mrb[75].mxu0  ;;  %2991 = vmatmul.mubr.bf16.vlgmr.msra.gmra.mrb[64].mxu1 %v1509_v44  ;;  %v1436_v56 = vmax.f32 %v1212_v49, 0.0 }
 0x2a9   :  { %v1207_v55 = vadd.f32 %v1206_v54, %v3606_v18  ;;  %v1434_v58 = vmax.f32 %v1204_v51, 0.0 }
 0x2aa   :  { %v1437_v57 = vmax.f32 %v1215_v53, 0.0 }
 0x2ab   :  { %v1435_v59 = vmax.f32 %v1207_v55, 0.0 }
 0x2ac   :  { %v1511_v60 = vpack.c.bf16 %v1437_v57, %v1436_v56 }
 0x2ad   :  { %v1510_v61 = vpack.c.bf16 %v1435_v59, %v1434_v58  ;;  %v2920_v62 = vpop.f32.mrb[76].mxu0 }
 0x2ae   :  { %v1228_v63 = vadd.f32 %v2920_v62, %v3606_v18  ;;  %v1219_v0 = vpop.f32.mrb[77].mxu0 }
 0x2af   :  { %v1220_v1 = vadd.f32 %v1219_v0, %v3606_v18  ;;  %v2921_v2 = vpop.f32.mrb[78].mxu0  ;;  %2994 = vmatprep.mubr.bf16.mxu1 %v1510_v61 }
 0x2b0   :  { %v1231_v3 = vadd.f32 %v2921_v2, %v3606_v18  ;;  %v1222_v4 = vpop.f32.mrb[79].mxu0  ;;  %2995 = vmatmul.mubr.bf16.gmra.mrb[68].mxu1 %v1511_v60  ;;  %v1440_v6 = vmax.f32 %v1228_v63, 0.0 }
 0x2b1   :  { %v1223_v5 = vadd.f32 %v1222_v4, %v3606_v18  ;;  %v1438_v8 = vmax.f32 %v1220_v1, 0.0 }
 0x2b2   :  { %v1441_v7 = vmax.f32 %v1231_v3, 0.0 }
 0x2b3   :  { %v1439_v9 = vmax.f32 %v1223_v5, 0.0 }
 0x2b4   :  { %v1513_v10 = vpack.c.bf16 %v1441_v7, %v1440_v6 }
 0x2b5   :  { %v1512_v11 = vpack.c.bf16 %v1439_v9, %v1438_v8  ;;  %v2924_v12 = vpop.f32.mrb[80].mxu0 }
 0x2b6   :  { %v1244_v13 = vadd.f32 %v2924_v12, %v3606_v18  ;;  %v1235_v14 = vpop.f32.mrb[81].mxu0 }
 0x2b7   :  { %v1236_v15 = vadd.f32 %v1235_v14, %v3606_v18  ;;  %v2925_v16 = vpop.f32.mrb[82].mxu0  ;;  %2998 = vmatprep.mubr.bf16.mxu1 %v1512_v11 }
 0x2b8   :  { %v1247_v19 = vadd.f32 %v2925_v16, %v3606_v18  ;;  %v1238_v33 = vpop.f32.mrb[83].mxu0  ;;  %2999 = vmatmul.mubr.bf16.gmra.mrb[72].mxu1 %v1513_v10  ;;  %v1444_v21 = vmax.f32 %v1244_v13, 0.0 }
 0x2b9   :  { %v1239_v20 = vadd.f32 %v1238_v33, %v3606_v18  ;;  %v1442_v23 = vmax.f32 %v1236_v15, 0.0 }
 0x2ba   :  { %v1445_v22 = vmax.f32 %v1247_v19, 0.0 }
 0x2bb   :  { %v1443_v24 = vmax.f32 %v1239_v20, 0.0 }
 0x2bc   :  { %v1515_v25 = vpack.c.bf16 %v1445_v22, %v1444_v21 }
 0x2bd   :  { %v1514_v26 = vpack.c.bf16 %v1443_v24, %v1442_v23  ;;  %v2928_v27 = vpop.f32.mrb[84].mxu0 }
 0x2be   :  { %v1260_v28 = vadd.f32 %v2928_v27, %v3606_v18  ;;  %v1251_v29 = vpop.f32.mrb[85].mxu0 }
 0x2bf   :  { %v1252_v30 = vadd.f32 %v1251_v29, %v3606_v18  ;;  %v2929_v31 = vpop.f32.mrb[86].mxu0  ;;  %3002 = vmatprep.mubr.bf16.mxu1 %v1514_v26 }
 0x2c0   :  { %v1263_v32 = vadd.f32 %v2929_v31, %v3606_v18  ;;  %v1254_v47 = vpop.f32.mrb[87].mxu0  ;;  %3003 = vmatmul.mubr.bf16.gmra.mrb[76].mxu1 %v1515_v25  ;;  %v1448_v35 = vmax.f32 %v1260_v28, 0.0 }
 0x2c1   :  { %v1255_v34 = vadd.f32 %v1254_v47, %v3606_v18  ;;  %v1446_v37 = vmax.f32 %v1252_v30, 0.0 }
 0x2c2   :  { %v1449_v36 = vmax.f32 %v1263_v32, 0.0 }
 0x2c3   :  { %v1447_v38 = vmax.f32 %v1255_v34, 0.0 }
 0x2c4   :  { %v1517_v39 = vpack.c.bf16 %v1449_v36, %v1448_v35 }
 0x2c5   :  { %v1516_v40 = vpack.c.bf16 %v1447_v38, %v1446_v37  ;;  %v2932_v45 = vpop.f32.mrb[88].mxu0 }
 0x2c6   :  { %v1276_v41 = vadd.f32 %v2932_v45, %v3606_v18  ;;  %v1267_v42 = vpop.f32.mrb[89].mxu0 }
 0x2c7   :  { %v1268_v44 = vadd.f32 %v1267_v42, %v3606_v18  ;;  %v2933_v46 = vpop.f32.mrb[90].mxu0  ;;  %3006 = vmatprep.mubr.bf16.mxu1 %v1516_v40 }
 0x2c8   :  { %v1279_v48 = vadd.f32 %v2933_v46, %v3606_v18  ;;  %v1270_v49 = vpop.f32.mrb[91].mxu0  ;;  %3007 = vmatmul.mubr.bf16.gmra.mrb[80].mxu1 %v1517_v39  ;;  %v1452_v51 = vmax.f32 %v1276_v41, 0.0 }
 0x2c9   :  { %v1271_v50 = vadd.f32 %v1270_v49, %v3606_v18  ;;  %v1450_v53 = vmax.f32 %v1268_v44, 0.0 }
 0x2ca   :  { %v1453_v52 = vmax.f32 %v1279_v48, 0.0 }
 0x2cb   :  { %v1451_v54 = vmax.f32 %v1271_v50, 0.0 }
 0x2cc   :  { %v1519_v55 = vpack.c.bf16 %v1453_v52, %v1452_v51 }
 0x2cd   :  { %v1518_v56 = vpack.c.bf16 %v1451_v54, %v1450_v53  ;;  %v2936_v57 = vpop.f32.mrb[92].mxu0 }
 0x2ce   :  { %v1292_v58 = vadd.f32 %v2936_v57, %v3606_v18  ;;  %v1283_v59 = vpop.f32.mrb[93].mxu0 }
 0x2cf   :  { %v1284_v60 = vadd.f32 %v1283_v59, %v3606_v18  ;;  %v2937_v61 = vpop.f32.mrb[94].mxu0  ;;  %3010 = vmatprep.mubr.bf16.mxu1 %v1518_v56 }
 0x2d0   :  { %v1295_v62 = vadd.f32 %v2937_v61, %v3606_v18  ;;  %v1286_v63 = vpop.f32.mrb[95].mxu0  ;;  %3011 = vmatmul.mubr.bf16.gmra.mrb[84].mxu1 %v1519_v55  ;;  %v1456_v1 = vmax.f32 %v1292_v58, 0.0 }
 0x2d1   :  { %v1287_v0 = vadd.f32 %v1286_v63, %v3606_v18  ;;  %v1454_v3 = vmax.f32 %v1284_v60, 0.0 }
 0x2d2   :  { %v1457_v2 = vmax.f32 %v1295_v62, 0.0 }
 0x2d3   :  { %v1455_v4 = vmax.f32 %v1287_v0, 0.0 }
 0x2d4   :  { %v1521_v5 = vpack.c.bf16 %v1457_v2, %v1456_v1 }
 0x2d5   :  { %v1520_v6 = vpack.c.bf16 %v1455_v4, %v1454_v3  ;;  %v2940_v7 = vpop.f32.mrb[96].mxu0 }
 0x2d6   :  { %v1308_v8 = vadd.f32 %v2940_v7, %v3606_v18  ;;  %v1299_v9 = vpop.f32.mrb[97].mxu0 }
 0x2d7   :  { %v1300_v10 = vadd.f32 %v1299_v9, %v3606_v18  ;;  %v2941_v11 = vpop.f32.mrb[98].mxu0  ;;  %3014 = vmatprep.mubr.bf16.mxu1 %v1520_v6 }
 0x2d8   :  { %v1311_v12 = vadd.f32 %v2941_v11, %v3606_v18  ;;  %v1302_v13 = vpop.f32.mrb[99].mxu0  ;;  %3015 = vmatmul.mubr.bf16.gmra.mrb[88].mxu1 %v1521_v5  ;;  %v1460_v15 = vmax.f32 %v1308_v8, 0.0 }
 0x2d9   :  { %v1303_v14 = vadd.f32 %v1302_v13, %v3606_v18  ;;  %v1458_v19 = vmax.f32 %v1300_v10, 0.0 }
 0x2da   :  { %v1461_v16 = vmax.f32 %v1311_v12, 0.0 }
 0x2db   :  { %v1459_v33 = vmax.f32 %v1303_v14, 0.0 }
 0x2dc   :  { %v1523_v20 = vpack.c.bf16 %v1461_v16, %v1460_v15 }
 0x2dd   :  { %v1522_v21 = vpack.c.bf16 %v1459_v33, %v1458_v19  ;;  %v2944_v22 = vpop.f32.mrb[100].mxu0 }
 0x2de   :  { %v1324_v23 = vadd.f32 %v2944_v22, %v3606_v18  ;;  %v1315_v24 = vpop.f32.mrb[101].mxu0 }
 0x2df   :  { %v1316_v25 = vadd.f32 %v1315_v24, %v3606_v18  ;;  %v2945_v26 = vpop.f32.mrb[102].mxu0  ;;  %3018 = vmatprep.mubr.bf16.mxu1 %v1522_v21 }
 0x2e0   :  { %v1327_v27 = vadd.f32 %v2945_v26, %v3606_v18  ;;  %v1318_v28 = vpop.f32.mrb[103].mxu0  ;;  %3019 = vmatmul.mubr.bf16.gmra.mrb[92].mxu1 %v1523_v20  ;;  %v1464_v30 = vmax.f32 %v1324_v23, 0.0 }
 0x2e1   :  { %v1319_v29 = vadd.f32 %v1318_v28, %v3606_v18  ;;  %v1462_v32 = vmax.f32 %v1316_v25, 0.0 }
 0x2e2   :  { %v1465_v31 = vmax.f32 %v1327_v27, 0.0 }
 0x2e3   :  { %v1463_v47 = vmax.f32 %v1319_v29, 0.0 }
 0x2e4   :  { %v1525_v34 = vpack.c.bf16 %v1465_v31, %v1464_v30 }
 0x2e5   :  { %v1524_v35 = vpack.c.bf16 %v1463_v47, %v1462_v32  ;;  %v2948_v36 = vpop.f32.mrb[104].mxu0 }
 0x2e6   :  { %v1340_v37 = vadd.f32 %v2948_v36, %v3606_v18  ;;  %v1331_v38 = vpop.f32.mrb[105].mxu0 }
 0x2e7   :  { %v1332_v39 = vadd.f32 %v1331_v38, %v3606_v18  ;;  %v2949_v40 = vpop.f32.mrb[106].mxu0  ;;  %3022 = vmatprep.mubr.bf16.mxu1 %v1524_v35 }
 0x2e8   :  { %v1343_v45 = vadd.f32 %v2949_v40, %v3606_v18  ;;  %v1334_v41 = vpop.f32.mrb[107].mxu0  ;;  %3023 = vmatmul.mubr.bf16.gmra.mrb[96].mxu1 %v1525_v34  ;;  %v1468_v44 = vmax.f32 %v1340_v37, 0.0 }
 0x2e9   :  { %v1335_v42 = vadd.f32 %v1334_v41, %v3606_v18  ;;  %v1466_v48 = vmax.f32 %v1332_v39, 0.0 }
 0x2ea   :  { %v1469_v46 = vmax.f32 %v1343_v45, 0.0 }
 0x2eb   :  { %v1467_v49 = vmax.f32 %v1335_v42, 0.0 }
 0x2ec   :  { %v1527_v50 = vpack.c.bf16 %v1469_v46, %v1468_v44 }
 0x2ed   :  { %v1526_v51 = vpack.c.bf16 %v1467_v49, %v1466_v48  ;;  %v2952_v52 = vpop.f32.mrb[108].mxu0 }
 0x2ee   :  { %v1356_v53 = vadd.f32 %v2952_v52, %v3606_v18  ;;  %v1347_v54 = vpop.f32.mrb[109].mxu0 }
 0x2ef   :  { %v1348_v55 = vadd.f32 %v1347_v54, %v3606_v18  ;;  %v2953_v56 = vpop.f32.mrb[110].mxu0  ;;  %3026 = vmatprep.mubr.bf16.mxu1 %v1526_v51 }
 0x2f0   :  { %v1359_v57 = vadd.f32 %v2953_v56, %v3606_v18  ;;  %v1350_v58 = vpop.f32.mrb[111].mxu0  ;;  %3027 = vmatmul.mubr.bf16.gmra.mrb[100].mxu1 %v1527_v50  ;;  %v1472_v60 = vmax.f32 %v1356_v53, 0.0 }
 0x2f1   :  { %v1351_v59 = vadd.f32 %v1350_v58, %v3606_v18  ;;  %v1470_v62 = vmax.f32 %v1348_v55, 0.0 }
 0x2f2   :  { %v1473_v61 = vmax.f32 %v1359_v57, 0.0 }
 0x2f3   :  { %v1471_v63 = vmax.f32 %v1351_v59, 0.0 }
 0x2f4   :  { %v1529_v0 = vpack.c.bf16 %v1473_v61, %v1472_v60  ;;  %v1540_v61 = vsub.s32 3, %v3411_v43 }
 0x2f5   :  { %v1528_v1 = vpack.c.bf16 %v1471_v63, %v1470_v62  ;;  %v2956_v2 = vpop.f32.mrb[112].mxu0 }
 0x2f6   :  { %v1372_v3 = vadd.f32 %v2956_v2, %v3606_v18  ;;  %v1363_v4 = vpop.f32.mrb[113].mxu0  ;;  %v3674_v62 = vrot.slane %v3603_v17, %v1540_v61 }
 0x2f7   :  { %v1364_v5 = vadd.f32 %v1363_v4, %v3606_v18  ;;  %v2957_v6 = vpop.f32.mrb[114].mxu0  ;;  %3030 = vmatprep.mubr.bf16.mxu1 %v1528_v1 }
 0x2f8   :  { %v1375_v7 = vadd.f32 %v2957_v6, %v3606_v18  ;;  %v1366_v8 = vpop.f32.mrb[115].mxu0  ;;  %3031 = vmatmul.mubr.bf16.gmra.mrb[104].mxu1 %v1529_v0  ;;  %v1476_v10 = vmax.f32 %v1372_v3, 0.0 }
 0x2f9   :  { %v1367_v9 = vadd.f32 %v1366_v8, %v3606_v18  ;;  %v1474_v12 = vmax.f32 %v1364_v5, 0.0 }
 0x2fa   :  { %v1477_v11 = vmax.f32 %v1375_v7, 0.0 }
 0x2fb   :  { %v1475_v13 = vmax.f32 %v1367_v9, 0.0 }
 0x2fc   :  { %v1531_v14 = vpack.c.bf16 %v1477_v11, %v1476_v10 }
 0x2fd   :  { %v1530_v15 = vpack.c.bf16 %v1475_v13, %v1474_v12  ;;  %v2960_v16 = vpop.f32.mrb[116].mxu0 }
 0x2fe   :  { %v1388_v19 = vadd.f32 %v2960_v16, %v3606_v18  ;;  %v1379_v33 = vpop.f32.mrb[117].mxu0 }
 0x2ff   :  { %v1380_v20 = vadd.f32 %v1379_v33, %v3606_v18  ;;  %v2961_v21 = vpop.f32.mrb[118].mxu0  ;;  %3034 = vmatprep.mubr.bf16.mxu1 %v1530_v15 }
 0x300   :  { %v1391_v22 = vadd.f32 %v2961_v21, %v3606_v18  ;;  %v1382_v23 = vpop.f32.mrb[119].mxu0  ;;  %3035 = vmatmul.mubr.bf16.gmra.mrb[108].mxu1 %v1531_v14  ;;  %v1480_v25 = vmax.f32 %v1388_v19, 0.0 }
 0x301   :  { %v1383_v24 = vadd.f32 %v1382_v23, %v3606_v18  ;;  %v1478_v27 = vmax.f32 %v1380_v20, 0.0 }
 0x302   :  { %v1481_v26 = vmax.f32 %v1391_v22, 0.0 }
 0x303   :  { %v1479_v28 = vmax.f32 %v1383_v24, 0.0 }
 0x304   :  { %v1533_v29 = vpack.c.bf16 %v1481_v26, %v1480_v25 }
 0x305   :  { %v1532_v30 = vpack.c.bf16 %v1479_v28, %v1478_v27  ;;  %v2964_v31 = vpop.f32.mrb[120].mxu0 }
 0x306   :  { %v1404_v32 = vadd.f32 %v2964_v31, %v3606_v18  ;;  %v1395_v47 = vpop.f32.mrb[121].mxu0 }
 0x307   :  { %v1396_v34 = vadd.f32 %v1395_v47, %v3606_v18  ;;  %v2965_v35 = vpop.f32.mrb[122].mxu0  ;;  %3038 = vmatprep.mubr.bf16.mxu1 %v1532_v30 }
 0x308   :  { %v1407_v36 = vadd.f32 %v2965_v35, %v3606_v18  ;;  %v1398_v37 = vpop.f32.mrb[123].mxu0  ;;  %3039 = vmatmul.mubr.bf16.gmra.mrb[112].mxu1 %v1533_v29  ;;  %v1484_v39 = vmax.f32 %v1404_v32, 0.0 }
 0x309   :  { %v1399_v38 = vadd.f32 %v1398_v37, %v3606_v18  ;;  %v1482_v45 = vmax.f32 %v1396_v34, 0.0 }
 0x30a   :  { %v1485_v40 = vmax.f32 %v1407_v36, 0.0 }
 0x30b   :  { %v1483_v41 = vmax.f32 %v1399_v38, 0.0 }
 0x30c   :  { %v1535_v42 = vpack.c.bf16 %v1485_v40, %v1484_v39 }
 0x30d   :  { %v1534_v44 = vpack.c.bf16 %v1483_v41, %v1482_v45  ;;  %v2968_v46 = vpop.f32.mrb[124].mxu0 }
 0x30e   :  { %v1420_v48 = vadd.f32 %v2968_v46, %v3606_v18  ;;  %v1411_v49 = vpop.f32.mrb[125].mxu0 }
 0x30f   :  { %v1412_v50 = vadd.f32 %v1411_v49, %v3606_v18  ;;  %v2969_v51 = vpop.f32.mrb[126].mxu0  ;;  %3042 = vmatprep.mubr.bf16.mxu1 %v1534_v44 }
 0x310   :  { %v1423_v52 = vadd.f32 %v2969_v51, %v3606_v18  ;;  %v1414_v53 = vpop.f32.mrb[127].mxu0  ;;  %3043 = vmatmul.mubr.bf16.gmra.mrb[116].mxu1 %v1535_v42  ;;  %v1488_v55 = vmax.f32 %v1420_v48, 0.0 }
 0x311   :  { %v1415_v54 = vadd.f32 %v1414_v53, %v3606_v18  ;;  %v1486_v57 = vmax.f32 %v1412_v50, 0.0 }
 0x312   :  { %v1489_v56 = vmax.f32 %v1423_v52, 0.0 }
 0x313   :  { %v1487_v58 = vmax.f32 %v1415_v54, 0.0 }
 0x314   :  { %v1537_v59 = vpack.c.bf16 %v1489_v56, %v1488_v55 }
 0x315   :  { %v1536_v60 = vpack.c.bf16 %v1487_v58, %v1486_v57 }
 0x317   :  { %3046 = vmatprep.mubr.bf16.mxu1 %v1536_v60 }
 0x318   :  { %3047 = vmatmul.mubr.bf16.gmra.mrb[120].mxu1 %v1537_v59 }
 0x373   :  { %v2988_v63 = vpop.f32.mrb[128].mxu0 }
 0x374   :  { %v1624_v0 = vpop.f32.mrb[129].mxu0  ;;  %v1633_v2 = vadd.f32 %v2988_v63, %v3674_v62 }
 0x375   :  { %v2989_v1 = vpop.f32.mrb[130].mxu0  ;;  %v1625_v4 = vadd.f32 %v1624_v0, %v3674_v62 }
 0x376   :  { %v1636_v18 = vadd.f32 %v2989_v1, %v3674_v62  ;;  %v1627_v3 = vpop.f32.mrb[131].mxu0 }
 0x377   :  { %v1628_v5 = vadd.f32 %v1627_v3, %v3674_v62 }
 0x378   :  { %v2408_v6 = vpack.c.bf16 %v1636_v18, %v1633_v2 }
 0x379   :  { %v2403_v7 = vpack.c.bf16 %v1628_v5, %v1625_v4 }
 0x37a   :  { %2560 = vst [vmem:[#allocation2 + $0x8] sm:$0xff] %v2408_v6  }
 0x37b   :  { %2404 = vst [vmem:[#allocation2] sm:$0xff] %v2403_v7   ;;  %v2992_v43 = vpop.f32.mrb[64].mxu1 }
 0x37c   :  { %v1640_v8 = vpop.f32.mrb[65].mxu1  ;;  %v1649_v9 = vadd.f32 %v2992_v43, %v3674_v62 }
 0x37d   :  { %v2993_v17 = vpop.f32.mrb[66].mxu1  ;;  %v1641_v12 = vadd.f32 %v1640_v8, %v3674_v62 }
 0x37e   :  { %v1652_v10 = vadd.f32 %v2993_v17, %v3674_v62  ;;  %v1643_v11 = vpop.f32.mrb[67].mxu1 }
 0x37f   :  { %v1644_v13 = vadd.f32 %v1643_v11, %v3674_v62 }
 0x380   :  { %v2418_v14 = vpack.c.bf16 %v1652_v10, %v1649_v9 }
 0x381   :  { %v2413_v15 = vpack.c.bf16 %v1644_v13, %v1641_v12 }
 0x382   :  { %2562 = vst [vmem:[#allocation2 + $0x18] sm:$0xff] %v2418_v14  }
 0x383   :  { %2561 = vst [vmem:[#allocation2 + $0x10] sm:$0xff] %v2413_v15   ;;  %v2996_v16 = vpop.f32.mrb[68].mxu1 }
 0x384   :  { %v1656_v19 = vpop.f32.mrb[69].mxu1  ;;  %v1665_v20 = vadd.f32 %v2996_v16, %v3674_v62 }
 0x385   :  { %v2997_v33 = vpop.f32.mrb[70].mxu1  ;;  %v1657_v23 = vadd.f32 %v1656_v19, %v3674_v62 }
 0x386   :  { %v1668_v21 = vadd.f32 %v2997_v33, %v3674_v62  ;;  %v1659_v22 = vpop.f32.mrb[71].mxu1 }
 0x387   :  { %v1660_v24 = vadd.f32 %v1659_v22, %v3674_v62 }
 0x388   :  { %v2428_v25 = vpack.c.bf16 %v1668_v21, %v1665_v20 }
 0x389   :  { %v2423_v26 = vpack.c.bf16 %v1660_v24, %v1657_v23 }
 0x38a   :  { %2564 = vst [vmem:[#allocation2 + $0x28] sm:$0xff] %v2428_v25  }
 0x38b   :  { %2563 = vst [vmem:[#allocation2 + $0x20] sm:$0xff] %v2423_v26   ;;  %v3000_v27 = vpop.f32.mrb[72].mxu1 }
 0x38c   :  { %v1672_v28 = vpop.f32.mrb[73].mxu1  ;;  %v1681_v30 = vadd.f32 %v3000_v27, %v3674_v62 }
 0x38d   :  { %v3001_v29 = vpop.f32.mrb[74].mxu1  ;;  %v1673_v47 = vadd.f32 %v1672_v28, %v3674_v62 }
 0x38e   :  { %v1684_v31 = vadd.f32 %v3001_v29, %v3674_v62  ;;  %v1675_v32 = vpop.f32.mrb[75].mxu1 }
 0x38f   :  { %v1676_v34 = vadd.f32 %v1675_v32, %v3674_v62 }
 0x390   :  { %v2438_v35 = vpack.c.bf16 %v1684_v31, %v1681_v30 }
 0x391   :  { %v2433_v36 = vpack.c.bf16 %v1676_v34, %v1673_v47 }
 0x392   :  { %2566 = vst [vmem:[#allocation2 + $0x38] sm:$0xff] %v2438_v35  }
 0x393   :  { %2565 = vst [vmem:[#allocation2 + $0x30] sm:$0xff] %v2433_v36   ;;  %v3004_v37 = vpop.f32.mrb[76].mxu1 }
 0x394   :  { %v1688_v38 = vpop.f32.mrb[77].mxu1  ;;  %v1697_v40 = vadd.f32 %v3004_v37, %v3674_v62 }
 0x395   :  { %v3005_v39 = vpop.f32.mrb[78].mxu1  ;;  %v1689_v42 = vadd.f32 %v1688_v38, %v3674_v62 }
 0x396   :  { %v1700_v45 = vadd.f32 %v3005_v39, %v3674_v62  ;;  %v1691_v41 = vpop.f32.mrb[79].mxu1 }
 0x397   :  { %v1692_v44 = vadd.f32 %v1691_v41, %v3674_v62 }
 0x398   :  { %v2448_v46 = vpack.c.bf16 %v1700_v45, %v1697_v40 }
 0x399   :  { %v2443_v48 = vpack.c.bf16 %v1692_v44, %v1689_v42 }
 0x39a   :  { %2568 = vst [vmem:[#allocation2 + $0x48] sm:$0xff] %v2448_v46  }
 0x39b   :  { %2567 = vst [vmem:[#allocation2 + $0x40] sm:$0xff] %v2443_v48   ;;  %v3008_v49 = vpop.f32.mrb[80].mxu1 }
 0x39c   :  { %v1704_v50 = vpop.f32.mrb[81].mxu1  ;;  %v1713_v52 = vadd.f32 %v3008_v49, %v3674_v62 }
 0x39d   :  { %v3009_v51 = vpop.f32.mrb[82].mxu1  ;;  %v1705_v55 = vadd.f32 %v1704_v50, %v3674_v62 }
 0x39e   :  { %v1716_v53 = vadd.f32 %v3009_v51, %v3674_v62  ;;  %v1707_v54 = vpop.f32.mrb[83].mxu1 }
 0x39f   :  { %v1708_v56 = vadd.f32 %v1707_v54, %v3674_v62 }
 0x3a0   :  { %v2458_v57 = vpack.c.bf16 %v1716_v53, %v1713_v52 }
 0x3a1   :  { %v2453_v58 = vpack.c.bf16 %v1708_v56, %v1705_v55 }
 0x3a2   :  { %2570 = vst [vmem:[#allocation2 + $0x58] sm:$0xff] %v2458_v57  }
 0x3a3   :  { %2569 = vst [vmem:[#allocation2 + $0x50] sm:$0xff] %v2453_v58   ;;  %v3012_v59 = vpop.f32.mrb[84].mxu1 }
 0x3a4   :  { %v1720_v60 = vpop.f32.mrb[85].mxu1  ;;  %v1729_v63 = vadd.f32 %v3012_v59, %v3674_v62 }
 0x3a5   :  { %v3013_v61 = vpop.f32.mrb[86].mxu1  ;;  %v1721_v2 = vadd.f32 %v1720_v60, %v3674_v62 }
 0x3a6   :  { %v1732_v0 = vadd.f32 %v3013_v61, %v3674_v62  ;;  %v1723_v1 = vpop.f32.mrb[87].mxu1 }
 0x3a7   :  { %v1724_v18 = vadd.f32 %v1723_v1, %v3674_v62 }
 0x3a8   :  { %v2468_v3 = vpack.c.bf16 %v1732_v0, %v1729_v63 }
 0x3a9   :  { %v2463_v4 = vpack.c.bf16 %v1724_v18, %v1721_v2 }
 0x3aa   :  { %2572 = vst [vmem:[#allocation2 + $0x68] sm:$0xff] %v2468_v3  }
 0x3ab   :  { %2571 = vst [vmem:[#allocation2 + $0x60] sm:$0xff] %v2463_v4   ;;  %v3016_v5 = vpop.f32.mrb[88].mxu1 }
 0x3ac   :  { %v1736_v6 = vpop.f32.mrb[89].mxu1  ;;  %v1745_v43 = vadd.f32 %v3016_v5, %v3674_v62 }
 0x3ad   :  { %v3017_v7 = vpop.f32.mrb[90].mxu1  ;;  %v1737_v9 = vadd.f32 %v1736_v6, %v3674_v62 }
 0x3ae   :  { %v1748_v8 = vadd.f32 %v3017_v7, %v3674_v62  ;;  %v1739_v17 = vpop.f32.mrb[91].mxu1 }
 0x3af   :  { %v1740_v10 = vadd.f32 %v1739_v17, %v3674_v62 }
 0x3b0   :  { %v2478_v11 = vpack.c.bf16 %v1748_v8, %v1745_v43 }
 0x3b1   :  { %v2473_v12 = vpack.c.bf16 %v1740_v10, %v1737_v9 }
 0x3b2   :  { %2574 = vst [vmem:[#allocation2 + $0x78] sm:$0xff] %v2478_v11  }
 0x3b3   :  { %2573 = vst [vmem:[#allocation2 + $0x70] sm:$0xff] %v2473_v12   ;;  %v3020_v13 = vpop.f32.mrb[92].mxu1 }
 0x3b4   :  { %v1752_v14 = vpop.f32.mrb[93].mxu1  ;;  %v1761_v16 = vadd.f32 %v3020_v13, %v3674_v62 }
 0x3b5   :  { %v3021_v15 = vpop.f32.mrb[94].mxu1  ;;  %v1753_v20 = vadd.f32 %v1752_v14, %v3674_v62 }
 0x3b6   :  { %v1764_v19 = vadd.f32 %v3021_v15, %v3674_v62  ;;  %v1755_v33 = vpop.f32.mrb[95].mxu1 }
 0x3b7   :  { %v1756_v21 = vadd.f32 %v1755_v33, %v3674_v62 }
 0x3b8   :  { %v2488_v22 = vpack.c.bf16 %v1764_v19, %v1761_v16 }
 0x3b9   :  { %v2483_v23 = vpack.c.bf16 %v1756_v21, %v1753_v20 }
 0x3ba   :  { %2576 = vst [vmem:[#allocation2 + $0x88] sm:$0xff] %v2488_v22  }
 0x3bb   :  { %2575 = vst [vmem:[#allocation2 + $0x80] sm:$0xff] %v2483_v23   ;;  %v3024_v24 = vpop.f32.mrb[96].mxu1 }
 0x3bc   :  { %v1768_v25 = vpop.f32.mrb[97].mxu1  ;;  %v1777_v27 = vadd.f32 %v3024_v24, %v3674_v62 }
 0x3bd   :  { %v3025_v26 = vpop.f32.mrb[98].mxu1  ;;  %v1769_v30 = vadd.f32 %v1768_v25, %v3674_v62 }
 0x3be   :  { %v1780_v28 = vadd.f32 %v3025_v26, %v3674_v62  ;;  %v1771_v29 = vpop.f32.mrb[99].mxu1 }
 0x3bf   :  { %v1772_v31 = vadd.f32 %v1771_v29, %v3674_v62 }
 0x3c0   :  { %v2498_v32 = vpack.c.bf16 %v1780_v28, %v1777_v27 }
 0x3c1   :  { %v2493_v47 = vpack.c.bf16 %v1772_v31, %v1769_v30 }
 0x3c2   :  { %2578 = vst [vmem:[#allocation2 + $0x98] sm:$0xff] %v2498_v32  }
 0x3c3   :  { %2577 = vst [vmem:[#allocation2 + $0x90] sm:$0xff] %v2493_v47   ;;  %v3028_v34 = vpop.f32.mrb[100].mxu1 }
 0x3c4   :  { %v1784_v35 = vpop.f32.mrb[101].mxu1  ;;  %v1793_v37 = vadd.f32 %v3028_v34, %v3674_v62 }
 0x3c5   :  { %v3029_v36 = vpop.f32.mrb[102].mxu1  ;;  %v1785_v40 = vadd.f32 %v1784_v35, %v3674_v62 }
 0x3c6   :  { %v1796_v38 = vadd.f32 %v3029_v36, %v3674_v62  ;;  %v1787_v39 = vpop.f32.mrb[103].mxu1 }
 0x3c7   :  { %v1788_v45 = vadd.f32 %v1787_v39, %v3674_v62 }
 0x3c8   :  { %v2508_v41 = vpack.c.bf16 %v1796_v38, %v1793_v37 }
 0x3c9   :  { %v2503_v42 = vpack.c.bf16 %v1788_v45, %v1785_v40 }
 0x3ca   :  { %2580 = vst [vmem:[#allocation2 + $0xa8] sm:$0xff] %v2508_v41  }
 0x3cb   :  { %2579 = vst [vmem:[#allocation2 + $0xa0] sm:$0xff] %v2503_v42   ;;  %v3032_v44 = vpop.f32.mrb[104].mxu1 }
 0x3cc   :  { %v1800_v46 = vpop.f32.mrb[105].mxu1  ;;  %v1809_v49 = vadd.f32 %v3032_v44, %v3674_v62 }
 0x3cd   :  { %v3033_v48 = vpop.f32.mrb[106].mxu1  ;;  %v1801_v52 = vadd.f32 %v1800_v46, %v3674_v62 }
 0x3ce   :  { %v1812_v50 = vadd.f32 %v3033_v48, %v3674_v62  ;;  %v1803_v51 = vpop.f32.mrb[107].mxu1 }
 0x3cf   :  { %v1804_v53 = vadd.f32 %v1803_v51, %v3674_v62 }
 0x3d0   :  { %v2518_v54 = vpack.c.bf16 %v1812_v50, %v1809_v49 }
 0x3d1   :  { %v2513_v55 = vpack.c.bf16 %v1804_v53, %v1801_v52 }
 0x3d2   :  { %2582 = vst [vmem:[#allocation2 + $0xb8] sm:$0xff] %v2518_v54  }
 0x3d3   :  { %2581 = vst [vmem:[#allocation2 + $0xb0] sm:$0xff] %v2513_v55   ;;  %v3036_v56 = vpop.f32.mrb[108].mxu1 }
 0x3d4   :  { %v1816_v57 = vpop.f32.mrb[109].mxu1  ;;  %v1825_v59 = vadd.f32 %v3036_v56, %v3674_v62 }
 0x3d5   :  { %v3037_v58 = vpop.f32.mrb[110].mxu1  ;;  %v1817_v63 = vadd.f32 %v1816_v57, %v3674_v62 }
 0x3d6   :  { %v1828_v60 = vadd.f32 %v3037_v58, %v3674_v62  ;;  %v1819_v61 = vpop.f32.mrb[111].mxu1 }
 0x3d7   :  { %v1820_v0 = vadd.f32 %v1819_v61, %v3674_v62 }
 0x3d8   :  { %v2528_v1 = vpack.c.bf16 %v1828_v60, %v1825_v59 }
 0x3d9   :  { %v2523_v2 = vpack.c.bf16 %v1820_v0, %v1817_v63 }
 0x3da   :  { %2584 = vst [vmem:[#allocation2 + $0xc8] sm:$0xff] %v2528_v1  }
 0x3db   :  { %2583 = vst [vmem:[#allocation2 + $0xc0] sm:$0xff] %v2523_v2   ;;  %v3040_v18 = vpop.f32.mrb[112].mxu1 }
 0x3dc   :  { %v1832_v3 = vpop.f32.mrb[113].mxu1  ;;  %v1841_v5 = vadd.f32 %v3040_v18, %v3674_v62 }
 0x3dd   :  { %v3041_v4 = vpop.f32.mrb[114].mxu1  ;;  %v1833_v43 = vadd.f32 %v1832_v3, %v3674_v62 }
 0x3de   :  { %v1844_v6 = vadd.f32 %v3041_v4, %v3674_v62  ;;  %v1835_v7 = vpop.f32.mrb[115].mxu1 }
 0x3df   :  { %v1836_v8 = vadd.f32 %v1835_v7, %v3674_v62 }
 0x3e0   :  { %v2538_v17 = vpack.c.bf16 %v1844_v6, %v1841_v5 }
 0x3e1   :  { %v2533_v9 = vpack.c.bf16 %v1836_v8, %v1833_v43 }
 0x3e2   :  { %2586 = vst [vmem:[#allocation2 + $0xd8] sm:$0xff] %v2538_v17  }
 0x3e3   :  { %2585 = vst [vmem:[#allocation2 + $0xd0] sm:$0xff] %v2533_v9   ;;  %v3044_v10 = vpop.f32.mrb[116].mxu1 }
 0x3e4   :  { %v1848_v11 = vpop.f32.mrb[117].mxu1  ;;  %v1857_v13 = vadd.f32 %v3044_v10, %v3674_v62 }
 0x3e5   :  { %v3045_v12 = vpop.f32.mrb[118].mxu1  ;;  %v1849_v16 = vadd.f32 %v1848_v11, %v3674_v62 }
 0x3e6   :  { %v1860_v14 = vadd.f32 %v3045_v12, %v3674_v62  ;;  %v1851_v15 = vpop.f32.mrb[119].mxu1 }
 0x3e7   :  { %v1852_v19 = vadd.f32 %v1851_v15, %v3674_v62 }
 0x3e8   :  { %v2548_v33 = vpack.c.bf16 %v1860_v14, %v1857_v13 }
 0x3e9   :  { %v2543_v20 = vpack.c.bf16 %v1852_v19, %v1849_v16 }
 0x3ea   :  { %2588 = vst [vmem:[#allocation2 + $0xe8] sm:$0xff] %v2548_v33  }
 0x3eb   :  { %2587 = vst [vmem:[#allocation2 + $0xe0] sm:$0xff] %v2543_v20   ;;  %v3048_v21 = vpop.f32.mrb[120].mxu1 }
 0x3ec   :  { %v1864_v22 = vpop.f32.mrb[121].mxu1  ;;  %v1873_v24 = vadd.f32 %v3048_v21, %v3674_v62 }
 0x3ed   :  { %v3049_v23 = vpop.f32.mrb[122].mxu1  ;;  %v1865_v27 = vadd.f32 %v1864_v22, %v3674_v62 }
 0x3ee   :  { %v1876_v25 = vadd.f32 %v3049_v23, %v3674_v62  ;;  %v1867_v26 = vpop.f32.mrb[123].mxu1 }
 0x3ef   :  { %v1868_v28 = vadd.f32 %v1867_v26, %v3674_v62 }
 0x3f0   :  { %v2558_v29 = vpack.c.bf16 %v1876_v25, %v1873_v24 }
 0x3f1   :  { %v2553_v30 = vpack.c.bf16 %v1868_v28, %v1865_v27 }
 0x3f2   :  { %2590 = vst [vmem:[#allocation2 + $0xf8] sm:$0xff] %v2558_v29  }
 0x3f3   :  { %2589 = vst [vmem:[#allocation2 + $0xf0] sm:$0xff] %v2553_v30  }
 0x3f4   :  { %3106 = shalt.err (!%p3103_p4)
}
 0x3f5   :  { %s3107_s25 = scalar_lea.hbm %s3758_s6, 4096 }
 0x3f6   :  { %p3108_p5 = scmp.ne.s32.totalorder %s3758_s6, %s3107_s25  ;;  %p3111_p6 = scmp.lt.u32.totalorder %s3107_s25, %s3758_s6 }
 0x3f8   :  { %p3113_p7 = pnand %p3111_p6, %p3108_p5 }
 0x3fa   :  { %3116 = shalt.err (!%p3113_p7)
}
 0x3fb   :  { %s3120_s30 = smov 64   ;;  %s3121_s1 = smov 4  }
 0x3fc   :  { %2210 = dma.vmem_to_hbm [thread:$0]  %s2205_s2, 4096, %s3758_s6, [#allocation3], %s3120_s30, %s3120_s30, %s3121_s1  }
 0x3fd   :  { %3117 = dma.done.wait [#allocation3], 4096  }
 0x3fe   :  { %3118 = vsyncadd [#allocation3], 4294963200 }
 0x3ff   :  { %2214 = vsyncpa [#allocation3], 1 }

</bundles_post_ra>
